<compile_context>
chip_gen: v6e
topology: v6e:2x2x1
jax: 0.10.0
libtpu: 0.0.40
codegen_flags: <defaults>
</compile_context>

<pallas_src>
import functools
import math

import jax
import jax.numpy as jnp
import numpy as np
from jax.experimental import pallas as pl
from jax.experimental.pallas import tpu as pltpu


def _encoder_layer_kernel(n_heads, d_k, cd, return_att,
                          xq_ref, xfull_ref, mask_ref,
                          wq_ref, bq_ref, wk_ref, bk_ref, wv_ref, bv_ref,
                          woh_ref, bo_ref, g1_ref, be1_ref,
                          w1_ref, b1_ref, w2_ref, b2_ref, g2_ref, be2_ref,
                          *refs):
    """One (batch, query-tile) step of the encoder layer.

    cd: compute dtype for MXU operands (bf16 by default); accumulation,
    softmax and LayerNorm math are f32.
    """
    if return_att:
        out_ref, att_ref = refs[0], refs[1]
        qh_ref, kh_ref, vh_ref = refs[2], refs[3], refs[4]
    else:
        out_ref, att_ref = refs[0], None
        qh_ref, kh_ref, vh_ref = refs[1], refs[2], refs[3]

    # ----- K/V projections: once per batch element (first query tile only) --
    # Scratch persists across the (arbitrary) qi grid axis, so later query
    # tiles reuse the cached head-major K/V instead of recomputing them.
    @pl.when(pl.program_id(1) == 0)
    def _project_kv():
        x_c = xfull_ref[0]                                        # (L, D) cd
        k = jnp.dot(x_c, wk_ref[...],
                    preferred_element_type=jnp.float32) + bk_ref[...]
        v = jnp.dot(x_c, wv_ref[...],
                    preferred_element_type=jnp.float32) + bv_ref[...]
        # TODO(synk): replace the per-head slice loop with a single
        # einshape-style head-major store once lane-splitting reshapes are
        # guaranteed to lower on all target generations; cost is amortized
        # over all query tiles of this batch element.
        for h in range(n_heads):
            sl = slice(h * d_k, (h + 1) * d_k)
            kh_ref[h] = k[:, sl].astype(cd)
            vh_ref[h] = v[:, sl].astype(cd)

    # ----- Q projection for this query tile ---------------------------------
    xq = xq_ref[0]                                                # (TQ, D) f32
    q = jnp.dot(xq.astype(cd), wq_ref[...],
                preferred_element_type=jnp.float32) + bq_ref[...]
    q = q * (1.0 / math.sqrt(d_k))                                # scale once
    for h in range(n_heads):
        qh_ref[h] = q[:, h * d_k:(h + 1) * d_k].astype(cd)

    # ----- attention: batched over heads -------------------------------------
    keep = mask_ref[...] != 0.0                                   # (1, 1, L)
    s = jnp.einsum("hqd,hkd->hqk", qh_ref[...], kh_ref[...],
                   preferred_element_type=jnp.float32)            # (H, TQ, L)
    s = jnp.where(keep, s, -1e9)                                  # mask keys once
    s = s - jnp.max(s, axis=-1, keepdims=True)
    p_un = jnp.exp(s)
    denom = jnp.sum(p_un, axis=-1, keepdims=True)
    # approximate reciprocal (EUP slot, nearly free) for the context path
    p = p_un * pl.reciprocal(denom, approx=True)
    if return_att:
        # exact normalization for the exported attention weights
        att_ref[0] = (p_un / denom).astype(att_ref.dtype)

    ctx = jnp.einsum("hqk,hkd->hqd", p.astype(cd), vh_ref[...],
                     preferred_element_type=jnp.float32)          # (H, TQ, dk)

    # output projection: Wo reshaped to (H, d_k, D) in the wrapper, so this is
    # a head-batched matmul + head-sum (same FLOPs as concat + full-D matmul,
    # but no (TQ, D) concat scratch and no per-head masked concat stores).
    o_h = jnp.einsum("hqd,hdm->hqm", ctx.astype(cd), woh_ref[...],
                     preferred_element_type=jnp.float32)          # (H, TQ, D)
    o = jnp.sum(o_h, axis=0) + bo_ref[...]

    # ----- residual + LayerNorm 1 (f32, eps=1e-5 like nn.LayerNorm) ----------
    r = o + xq
    mu = jnp.mean(r, axis=-1, keepdims=True)
    var = jnp.mean(jnp.square(r - mu), axis=-1, keepdims=True)
    a_out = (r - mu) * jax.lax.rsqrt(var + 1e-5) * g1_ref[...] + be1_ref[...]

    # ----- position-wise feed-forward + residual + LayerNorm 2 ---------------
    h1 = jnp.maximum(
        jnp.dot(a_out.astype(cd), w1_ref[...],
                preferred_element_type=jnp.float32) + b1_ref[...], 0.0)
    h2 = jnp.dot(h1.astype(cd), w2_ref[...],
                 preferred_element_type=jnp.float32) + b2_ref[...]
    r2 = h2 + a_out
    mu2 = jnp.mean(r2, axis=-1, keepdims=True)
    var2 = jnp.mean(jnp.square(r2 - mu2), axis=-1, keepdims=True)
    out_ref[0] = ((r2 - mu2) * jax.lax.rsqrt(var2 + 1e-5)
                  * g2_ref[...] + be2_ref[...]).astype(out_ref.dtype)
    # TODO(synk): dropout omitted (eval semantics); training-mode dropout
    # would use pltpu.prng_seed / pltpu.prng_random_bits.
    # TODO(synk): for long sequences, replace the dense (H, TQ, L) score block
    # with an online-softmax loop over key tiles so scores and the full-L
    # head-major K/V scratch do not dominate VMEM.


def _default_vmem_limit_bytes():
    """Per-generation VMEM budget: ~48 MiB on v7x (64 MiB cap), 100 MiB on
    v5e/v6e (128 MiB cap), leaving headroom for compiler-internal scratch."""
    cap = None
    try:
        cap = getattr(pltpu.get_tpu_info(), "vmem_capacity_bytes", None)
    except Exception:  # hardware query unavailable on this build
        cap = None
    if not cap:
        return 64 * 1024 * 1024
    return int(max(min(cap - 16 * 1024 * 1024, 100 * 1024 * 1024),
                   32 * 1024 * 1024))


def encoder_layer(x, params, mask=None, *, n_heads, q_tile=None,
                  compute_dtype=jnp.bfloat16, att_dtype=jnp.float32,
                  return_attention=True, vmem_limit_bytes=None):
    B, L, D = x.shape
    assert D % n_heads == 0
    d_k = D // n_heads
    tq = L if q_tile is None else q_tile
    assert L % tq == 0, "q_tile must divide seq_len"
    assert tq == L or tq % 8 == 0, "q_tile must be a multiple of 8 (sublane)"
    n_q = L // tq

    if mask is None:
        mask = jnp.ones((B, 1, L), jnp.float32)
    mask = mask.astype(jnp.float32)

    if vmem_limit_bytes is None:
        vmem_limit_bytes = _default_vmem_limit_bytes()

    cd = compute_dtype
    x = x.astype(jnp.float32)
    x_cd = x.astype(cd)        # K/V projection operand: halves full-seq traffic

    # Wo reshaped host-side to (H, d_k, D) -> head-batched output projection.
    wo_h = params["wo"].reshape(n_heads, d_k, D)

    # matmul weights in compute dtype (halves weight VMEM for bf16);
    # biases / LayerNorm params stay f32 (added to f32 accumulations).
    weight_args = (
        params["wq"].astype(cd), params["bq"].astype(jnp.float32),
        params["wk"].astype(cd), params["bk"].astype(jnp.float32),
        params["wv"].astype(cd), params["bv"].astype(jnp.float32),
        wo_h.astype(cd), params["bo"].astype(jnp.float32),
        params["g1"].astype(jnp.float32), params["be1"].astype(jnp.float32),
        params["w1"].astype(cd), params["b1"].astype(jnp.float32),
        params["w2"].astype(cd), params["b2"].astype(jnp.float32),
        params["g2"].astype(jnp.float32), params["be2"].astype(jnp.float32),
    )

    kernel = functools.partial(_encoder_layer_kernel, n_heads, d_k, cd,
                               return_attention)

    # weights pinned whole in VMEM (single copy, no double-buffering)
    wspecs = [pl.BlockSpec(memory_space=pltpu.MemorySpace.VMEM)
              for _ in weight_args]
    in_specs = [
        pl.BlockSpec((1, tq, D), lambda b, qi: (b, qi, 0)),   # x tile (f32): Q + residual
        pl.BlockSpec((1, L, D), lambda b, qi: (b, 0, 0)),     # full-seq x (bf16): K/V only
        pl.BlockSpec((1, 1, L), lambda b, qi: (b, 0, 0)),     # key padding mask
    ] + wspecs

    out_specs = [pl.BlockSpec((1, tq, D), lambda b, qi: (b, qi, 0))]
    out_shape = [jax.ShapeDtypeStruct((B, L, D), jnp.float32)]
    if return_attention:
        # NOTE: for production L, pad L to a multiple of 128 so this writeback
        # is lane-dense; use return_attention=False (or att_dtype=bf16) when
        # the attention matrix is not consumed downstream — the (B,H,L,L)
        # tensor otherwise dominates HBM traffic and VMEM.
        out_specs.append(
            pl.BlockSpec((1, n_heads, tq, L), lambda b, qi: (b, 0, qi, 0)))
        out_shape.append(
            jax.ShapeDtypeStruct((B, n_heads, L, L), att_dtype))

    scratch_shapes = [
        pltpu.VMEM((n_heads, tq, d_k), cd),   # head-major Q (per query tile)
        pltpu.VMEM((n_heads, L, d_k), cd),    # head-major K cache (per batch elem)
        pltpu.VMEM((n_heads, L, d_k), cd),    # head-major V cache (per batch elem)
    ]

    call = pl.pallas_call(
        kernel,
        grid=(B, n_q),
        in_specs=in_specs,
        out_specs=tuple(out_specs),
        out_shape=tuple(out_shape),
        scratch_shapes=scratch_shapes,
        compiler_params=pltpu.CompilerParams(
            # batch axis parallel (megacore split on v7x); query-tile axis
            # arbitrary so the K/V scratch computed at qi==0 persists across
            # the remaining tiles of the same batch element.
            dimension_semantics=("parallel", "arbitrary"),
            vmem_limit_bytes=vmem_limit_bytes),
    )

    res = call(x, x_cd, mask, *weight_args)
    if return_attention:
        out, att = res
        return out, att
    return res[0], None


def _init_params(key, d_model, n_heads, hidden_size):
    ks = jax.random.split(key, 6)
    sd = 0.1
    return {
        "wq": sd * jax.random.normal(ks[0], (d_model, d_model), jnp.float32),
        "bq": jnp.zeros((1, d_model), jnp.float32),
        "wk": sd * jax.random.normal(ks[1], (d_model, d_model), jnp.float32),
        "bk": jnp.zeros((1, d_model), jnp.float32),
        "wv": sd * jax.random.normal(ks[2], (d_model, d_model), jnp.float32),
        "bv": jnp.zeros((1, d_model), jnp.float32),
        "wo": sd * jax.random.normal(ks[3], (d_model, d_model), jnp.float32),
        "bo": jnp.zeros((1, d_model), jnp.float32),
        "g1": jnp.ones((1, d_model), jnp.float32),
        "be1": jnp.zeros((1, d_model), jnp.float32),
        "w1": sd * jax.random.normal(ks[4], (d_model, hidden_size), jnp.float32),
        "b1": jnp.zeros((1, hidden_size), jnp.float32),
        "w2": sd * jax.random.normal(ks[5], (hidden_size, d_model), jnp.float32),
        "b2": jnp.zeros((1, d_model), jnp.float32),
        "g2": jnp.ones((1, d_model), jnp.float32),
        "be2": jnp.zeros((1, d_model), jnp.float32),
    }


def _reference(x, params, mask, n_heads):
    """Pure-JAX f32 reference mirroring the PyTorch forward (eval mode)."""
    B, L, D = x.shape
    d_k = D // n_heads

    def lin(v, w, b):
        return v @ w + b

    q = lin(x, params["wq"], params["bq"]).reshape(B, L, n_heads, d_k).transpose(0, 2, 1, 3)
    k = lin(x, params["wk"], params["bk"]).reshape(B, L, n_heads, d_k).transpose(0, 2, 1, 3)
    v = lin(x, params["wv"], params["bv"]).reshape(B, L, n_heads, d_k).transpose(0, 2, 1, 3)
    s = jnp.einsum("bhqd,bhkd->bhqk", q / jnp.sqrt(d_k), k)
    s = jnp.where(mask[:, :, None, :] == 0.0, -1e9, s)
    att = jax.nn.softmax(s, axis=-1)
    ctx = jnp.einsum("bhqk,bhkd->bhqd", att, v).transpose(0, 2, 1, 3).reshape(B, L, D)
    o = lin(ctx, params["wo"], params["bo"]) + x

    def ln(v, g, b):
        mu = jnp.mean(v, -1, keepdims=True)
        var = jnp.mean(jnp.square(v - mu), -1, keepdims=True)
        return (v - mu) * jax.lax.rsqrt(var + 1e-5) * g + b

    a_out = ln(o, params["g1"], params["be1"])
    ff = lin(jnp.maximum(lin(a_out, params["w1"], params["b1"]), 0.0),
             params["w2"], params["b2"])
    out = ln(ff + a_out, params["g2"], params["be2"])
    return out, att


if __name__ == "__main__":
    B, L, D, n_heads, hidden = 2, 16, 32, 4, 64

    key = jax.random.PRNGKey(0)
    kx, kp = jax.random.split(key)
    x = jax.random.normal(kx, (B, L, D), jnp.float32)
    params = _init_params(kp, D, n_heads, hidden)

    # padding mask: batch 1 has its last 3 tokens padded
    mask = jnp.ones((B, 1, L), jnp.float32).at[1, 0, L - 3:].set(0.0)

    # q_tile=8 exercises both the 2-D (batch, query-tile) grid and the
    # K/V-cache-across-query-tiles path (qi > 0 reuses kh/vh scratch).
    out, att = encoder_layer(x, params, mask, n_heads=n_heads, q_tile=8)
    jax.block_until_ready((out, att))

    ref_out, ref_att = _reference(x, params, mask, n_heads)
    # tolerances account for bf16 matmul operands (f32 accumulation)
    np.testing.assert_allclose(np.asarray(out), np.asarray(ref_out), rtol=2e-2, atol=2e-2)
    np.testing.assert_allclose(np.asarray(att), np.asarray(ref_att), rtol=2e-2, atol=2e-2)

    print("KERNEL_OK")
</pallas_src>

<mosaic_0001>
module attributes {stable_mosaic.version = 11 : i64} {
  func.func @_encoder_layer_kernel(%arg0: i32, %arg1: i32, %arg2: memref<1x8x32xf32, #tpu.memory_space<vmem>>, %arg3: memref<1x16x32xbf16, #tpu.memory_space<vmem>>, %arg4: memref<1x1x16xf32, #tpu.memory_space<vmem>>, %arg5: memref<32x32xbf16, #tpu.memory_space<vmem>>, %arg6: memref<1x32xf32, #tpu.memory_space<vmem>>, %arg7: memref<32x32xbf16, #tpu.memory_space<vmem>>, %arg8: memref<1x32xf32, #tpu.memory_space<vmem>>, %arg9: memref<32x32xbf16, #tpu.memory_space<vmem>>, %arg10: memref<1x32xf32, #tpu.memory_space<vmem>>, %arg11: memref<4x8x32xbf16, #tpu.memory_space<vmem>>, %arg12: memref<1x32xf32, #tpu.memory_space<vmem>>, %arg13: memref<1x32xf32, #tpu.memory_space<vmem>>, %arg14: memref<1x32xf32, #tpu.memory_space<vmem>>, %arg15: memref<32x64xbf16, #tpu.memory_space<vmem>>, %arg16: memref<1x64xf32, #tpu.memory_space<vmem>>, %arg17: memref<64x32xbf16, #tpu.memory_space<vmem>>, %arg18: memref<1x32xf32, #tpu.memory_space<vmem>>, %arg19: memref<1x32xf32, #tpu.memory_space<vmem>>, %arg20: memref<1x32xf32, #tpu.memory_space<vmem>>, %arg21: memref<1x8x32xf32, #tpu.memory_space<vmem>>, %arg22: memref<1x4x8x16xf32, #tpu.memory_space<vmem>>, %arg23: memref<4x8x8xbf16, #tpu.memory_space<vmem>>, %arg24: memref<4x16x8xbf16, #tpu.memory_space<vmem>>, %arg25: memref<4x16x8xbf16, #tpu.memory_space<vmem>>) attributes {dimension_semantics = [#tpu.dimension_semantics<parallel>, #tpu.dimension_semantics<arbitrary>], iteration_bounds = array<i64: 2, 2>, scalar_prefetch = 0 : i64, scratch_operands = 3 : i64, tpu.core_type = #tpu.core_type<tc>, window_params = [{transform_indices = @transform_0, window_bounds = array<i64: 1, 8, 32>}, {transform_indices = @transform_1, window_bounds = array<i64: 1, 16, 32>}, {transform_indices = @transform_2, window_bounds = array<i64: 1, 1, 16>}, {pipeline_mode = #tpu.pipeline_mode<synchronous>, transform_indices = @transform_3, window_bounds = array<i64: 32, 32>}, {pipeline_mode = #tpu.pipeline_mode<synchronous>, transform_indices = @transform_4, window_bounds = array<i64: 1, 32>}, {pipeline_mode = #tpu.pipeline_mode<synchronous>, transform_indices = @transform_5, window_bounds = array<i64: 32, 32>}, {pipeline_mode = #tpu.pipeline_mode<synchronous>, transform_indices = @transform_6, window_bounds = array<i64: 1, 32>}, {pipeline_mode = #tpu.pipeline_mode<synchronous>, transform_indices = @transform_7, window_bounds = array<i64: 32, 32>}, {pipeline_mode = #tpu.pipeline_mode<synchronous>, transform_indices = @transform_8, window_bounds = array<i64: 1, 32>}, {pipeline_mode = #tpu.pipeline_mode<synchronous>, transform_indices = @transform_9, window_bounds = array<i64: 4, 8, 32>}, {pipeline_mode = #tpu.pipeline_mode<synchronous>, transform_indices = @transform_10, window_bounds = array<i64: 1, 32>}, {pipeline_mode = #tpu.pipeline_mode<synchronous>, transform_indices = @transform_11, window_bounds = array<i64: 1, 32>}, {pipeline_mode = #tpu.pipeline_mode<synchronous>, transform_indices = @transform_12, window_bounds = array<i64: 1, 32>}, {pipeline_mode = #tpu.pipeline_mode<synchronous>, transform_indices = @transform_13, window_bounds = array<i64: 32, 64>}, {pipeline_mode = #tpu.pipeline_mode<synchronous>, transform_indices = @transform_14, window_bounds = array<i64: 1, 64>}, {pipeline_mode = #tpu.pipeline_mode<synchronous>, transform_indices = @transform_15, window_bounds = array<i64: 64, 32>}, {pipeline_mode = #tpu.pipeline_mode<synchronous>, transform_indices = @transform_16, window_bounds = array<i64: 1, 32>}, {pipeline_mode = #tpu.pipeline_mode<synchronous>, transform_indices = @transform_17, window_bounds = array<i64: 1, 32>}, {pipeline_mode = #tpu.pipeline_mode<synchronous>, transform_indices = @transform_18, window_bounds = array<i64: 1, 32>}, {transform_indices = @transform_19, window_bounds = array<i64: 1, 8, 32>}, {transform_indices = @transform_20, window_bounds = array<i64: 1, 4, 8, 16>}]} {
    %c0_i32 = arith.constant 0 : i32
    %0 = arith.cmpi eq, %arg1, %c0_i32 : i32
    %1 = arith.extui %0 : i1 to i32
    %c0_i32_0 = arith.constant 0 : i32
    %2 = arith.cmpi ne, %1, %c0_i32_0 : i32
    scf.if %2 {
      %c0_78 = arith.constant 0 : index
      %c0_79 = arith.constant 0 : index
      %c0_80 = arith.constant 0 : index
      %135 = vector.load %arg3[%c0_78, %c0_79, %c0_80] : memref<1x16x32xbf16, #tpu.memory_space<vmem>>, vector<1x16x32xbf16>
      %136 = vector.shape_cast %135 : vector<1x16x32xbf16> to vector<16x32xbf16>
      %c0_81 = arith.constant 0 : index
      %c0_82 = arith.constant 0 : index
      %137 = vector.load %arg7[%c0_81, %c0_82] : memref<32x32xbf16, #tpu.memory_space<vmem>>, vector<32x32xbf16>
      %cst_83 = arith.constant dense<0.000000e+00> : vector<16x32xf32>
      %138 = tpu.matmul %136, %137, %cst_83 {dimension_numbers = #tpu.dot_dimension_numbers<[1], [0], [0], [1], [0, 0, 1, 1], [], []>} : vector<16x32xbf16>, vector<32x32xbf16>, vector<16x32xf32> -> vector<16x32xf32>
      %c0_84 = arith.constant 0 : index
      %c0_85 = arith.constant 0 : index
      %139 = vector.load %arg8[%c0_84, %c0_85] : memref<1x32xf32, #tpu.memory_space<vmem>>, vector<1x32xf32>
      %140 = vector.broadcast %139 : vector<1x32xf32> to vector<16x32xf32>
      %141 = arith.addf %138, %140 : vector<16x32xf32>
      %c0_86 = arith.constant 0 : index
      %c0_87 = arith.constant 0 : index
      %142 = vector.load %arg9[%c0_86, %c0_87] : memref<32x32xbf16, #tpu.memory_space<vmem>>, vector<32x32xbf16>
      %cst_88 = arith.constant dense<0.000000e+00> : vector<16x32xf32>
      %143 = tpu.matmul %136, %142, %cst_88 {dimension_numbers = #tpu.dot_dimension_numbers<[1], [0], [0], [1], [0, 0, 1, 1], [], []>} : vector<16x32xbf16>, vector<32x32xbf16>, vector<16x32xf32> -> vector<16x32xf32>
      %c0_89 = arith.constant 0 : index
      %c0_90 = arith.constant 0 : index
      %144 = vector.load %arg10[%c0_89, %c0_90] : memref<1x32xf32, #tpu.memory_space<vmem>>, vector<1x32xf32>
      %145 = vector.broadcast %144 : vector<1x32xf32> to vector<16x32xf32>
      %146 = arith.addf %143, %145 : vector<16x32xf32>
      %147 = vector.extract_strided_slice %141 {offsets = [0, 0], sizes = [16, 8], strides = [1, 1]} : vector<16x32xf32> to vector<16x8xf32>
      %148 = arith.truncf %147 : vector<16x8xf32> to vector<16x8xbf16>
      %c0_91 = arith.constant 0 : index
      %c0_92 = arith.constant 0 : index
      %c0_93 = arith.constant 0 : index
      %149 = vector.load %arg24[%c0_91, %c0_92, %c0_93] : memref<4x16x8xbf16, #tpu.memory_space<vmem>>, vector<1x16x8xbf16>
      %150 = vector.shape_cast %149 : vector<1x16x8xbf16> to vector<16x8xbf16>
      %151 = vector.shape_cast %148 : vector<16x8xbf16> to vector<1x16x8xbf16>
      tpu.vector_store %arg24[%c0_91, %c0_92, %c0_93], %151 {strides = array<i32>} : memref<4x16x8xbf16, #tpu.memory_space<vmem>>, vector<1x16x8xbf16>,
      %152 = vector.extract_strided_slice %146 {offsets = [0, 0], sizes = [16, 8], strides = [1, 1]} : vector<16x32xf32> to vector<16x8xf32>
      %153 = arith.truncf %152 : vector<16x8xf32> to vector<16x8xbf16>
      %c0_94 = arith.constant 0 : index
      %c0_95 = arith.constant 0 : index
      %c0_96 = arith.constant 0 : index
      %154 = vector.load %arg25[%c0_94, %c0_95, %c0_96] : memref<4x16x8xbf16, #tpu.memory_space<vmem>>, vector<1x16x8xbf16>
      %155 = vector.shape_cast %154 : vector<1x16x8xbf16> to vector<16x8xbf16>
      %156 = vector.shape_cast %153 : vector<16x8xbf16> to vector<1x16x8xbf16>
      tpu.vector_store %arg25[%c0_94, %c0_95, %c0_96], %156 {strides = array<i32>} : memref<4x16x8xbf16, #tpu.memory_space<vmem>>, vector<1x16x8xbf16>,
      %157 = vector.extract_strided_slice %141 {offsets = [0, 8], sizes = [16, 8], strides = [1, 1]} : vector<16x32xf32> to vector<16x8xf32>
      %158 = arith.truncf %157 : vector<16x8xf32> to vector<16x8xbf16>
      %c1_97 = arith.constant 1 : index
      %c0_98 = arith.constant 0 : index
      %c0_99 = arith.constant 0 : index
      %159 = vector.load %arg24[%c1_97, %c0_98, %c0_99] : memref<4x16x8xbf16, #tpu.memory_space<vmem>>, vector<1x16x8xbf16>
      %160 = vector.shape_cast %159 : vector<1x16x8xbf16> to vector<16x8xbf16>
      %161 = vector.shape_cast %158 : vector<16x8xbf16> to vector<1x16x8xbf16>
      tpu.vector_store %arg24[%c1_97, %c0_98, %c0_99], %161 {strides = array<i32>} : memref<4x16x8xbf16, #tpu.memory_space<vmem>>, vector<1x16x8xbf16>,
      %162 = vector.extract_strided_slice %146 {offsets = [0, 8], sizes = [16, 8], strides = [1, 1]} : vector<16x32xf32> to vector<16x8xf32>
      %163 = arith.truncf %162 : vector<16x8xf32> to vector<16x8xbf16>
      %c1_100 = arith.constant 1 : index
      %c0_101 = arith.constant 0 : index
      %c0_102 = arith.constant 0 : index
      %164 = vector.load %arg25[%c1_100, %c0_101, %c0_102] : memref<4x16x8xbf16, #tpu.memory_space<vmem>>, vector<1x16x8xbf16>
      %165 = vector.shape_cast %164 : vector<1x16x8xbf16> to vector<16x8xbf16>
      %166 = vector.shape_cast %163 : vector<16x8xbf16> to vector<1x16x8xbf16>
      tpu.vector_store %arg25[%c1_100, %c0_101, %c0_102], %166 {strides = array<i32>} : memref<4x16x8xbf16, #tpu.memory_space<vmem>>, vector<1x16x8xbf16>,
      %167 = vector.extract_strided_slice %141 {offsets = [0, 16], sizes = [16, 8], strides = [1, 1]} : vector<16x32xf32> to vector<16x8xf32>
      %168 = arith.truncf %167 : vector<16x8xf32> to vector<16x8xbf16>
      %c2_103 = arith.constant 2 : index
      %c0_104 = arith.constant 0 : index
      %c0_105 = arith.constant 0 : index
      %169 = vector.load %arg24[%c2_103, %c0_104, %c0_105] : memref<4x16x8xbf16, #tpu.memory_space<vmem>>, vector<1x16x8xbf16>
      %170 = vector.shape_cast %169 : vector<1x16x8xbf16> to vector<16x8xbf16>
      %171 = vector.shape_cast %168 : vector<16x8xbf16> to vector<1x16x8xbf16>
      tpu.vector_store %arg24[%c2_103, %c0_104, %c0_105], %171 {strides = array<i32>} : memref<4x16x8xbf16, #tpu.memory_space<vmem>>, vector<1x16x8xbf16>,
      %172 = vector.extract_strided_slice %146 {offsets = [0, 16], sizes = [16, 8], strides = [1, 1]} : vector<16x32xf32> to vector<16x8xf32>
      %173 = arith.truncf %172 : vector<16x8xf32> to vector<16x8xbf16>
      %c2_106 = arith.constant 2 : index
      %c0_107 = arith.constant 0 : index
      %c0_108 = arith.constant 0 : index
      %174 = vector.load %arg25[%c2_106, %c0_107, %c0_108] : memref<4x16x8xbf16, #tpu.memory_space<vmem>>, vector<1x16x8xbf16>
      %175 = vector.shape_cast %174 : vector<1x16x8xbf16> to vector<16x8xbf16>
      %176 = vector.shape_cast %173 : vector<16x8xbf16> to vector<1x16x8xbf16>
      tpu.vector_store %arg25[%c2_106, %c0_107, %c0_108], %176 {strides = array<i32>} : memref<4x16x8xbf16, #tpu.memory_space<vmem>>, vector<1x16x8xbf16>,
      %177 = vector.extract_strided_slice %141 {offsets = [0, 24], sizes = [16, 8], strides = [1, 1]} : vector<16x32xf32> to vector<16x8xf32>
      %178 = arith.truncf %177 : vector<16x8xf32> to vector<16x8xbf16>
      %c3_109 = arith.constant 3 : index
      %c0_110 = arith.constant 0 : index
      %c0_111 = arith.constant 0 : index
      %179 = vector.load %arg24[%c3_109, %c0_110, %c0_111] : memref<4x16x8xbf16, #tpu.memory_space<vmem>>, vector<1x16x8xbf16>
      %180 = vector.shape_cast %179 : vector<1x16x8xbf16> to vector<16x8xbf16>
      %181 = vector.shape_cast %178 : vector<16x8xbf16> to vector<1x16x8xbf16>
      tpu.vector_store %arg24[%c3_109, %c0_110, %c0_111], %181 {strides = array<i32>} : memref<4x16x8xbf16, #tpu.memory_space<vmem>>, vector<1x16x8xbf16>,
      %182 = vector.extract_strided_slice %146 {offsets = [0, 24], sizes = [16, 8], strides = [1, 1]} : vector<16x32xf32> to vector<16x8xf32>
      %183 = arith.truncf %182 : vector<16x8xf32> to vector<16x8xbf16>
      %c3_112 = arith.constant 3 : index
      %c0_113 = arith.constant 0 : index
      %c0_114 = arith.constant 0 : index
      %184 = vector.load %arg25[%c3_112, %c0_113, %c0_114] : memref<4x16x8xbf16, #tpu.memory_space<vmem>>, vector<1x16x8xbf16>
      %185 = vector.shape_cast %184 : vector<1x16x8xbf16> to vector<16x8xbf16>
      %186 = vector.shape_cast %183 : vector<16x8xbf16> to vector<1x16x8xbf16>
      tpu.vector_store %arg25[%c3_112, %c0_113, %c0_114], %186 {strides = array<i32>} : memref<4x16x8xbf16, #tpu.memory_space<vmem>>, vector<1x16x8xbf16>,
    } else {
    }
    %c0 = arith.constant 0 : index
    %c0_1 = arith.constant 0 : index
    %c0_2 = arith.constant 0 : index
    %3 = vector.load %arg2[%c0, %c0_1, %c0_2] : memref<1x8x32xf32, #tpu.memory_space<vmem>>, vector<1x8x32xf32>
    %4 = vector.shape_cast %3 : vector<1x8x32xf32> to vector<8x32xf32>
    %5 = arith.truncf %4 : vector<8x32xf32> to vector<8x32xbf16>
    %c0_3 = arith.constant 0 : index
    %c0_4 = arith.constant 0 : index
    %6 = vector.load %arg5[%c0_3, %c0_4] : memref<32x32xbf16, #tpu.memory_space<vmem>>, vector<32x32xbf16>
    %cst = arith.constant dense<0.000000e+00> : vector<8x32xf32>
    %7 = tpu.matmul %5, %6, %cst {dimension_numbers = #tpu.dot_dimension_numbers<[1], [0], [0], [1], [0, 0, 1, 1], [], []>} : vector<8x32xbf16>, vector<32x32xbf16>, vector<8x32xf32> -> vector<8x32xf32>
    %c0_5 = arith.constant 0 : index
    %c0_6 = arith.constant 0 : index
    %8 = vector.load %arg6[%c0_5, %c0_6] : memref<1x32xf32, #tpu.memory_space<vmem>>, vector<1x32xf32>
    %9 = vector.broadcast %8 : vector<1x32xf32> to vector<8x32xf32>
    %10 = arith.addf %7, %9 : vector<8x32xf32>
    %cst_7 = arith.constant 0.353553385 : f32
    %11 = vector.broadcast %cst_7 : f32 to vector<8x32xf32>
    %12 = arith.mulf %10, %11 : vector<8x32xf32>
    %13 = vector.extract_strided_slice %12 {offsets = [0, 0], sizes = [8, 8], strides = [1, 1]} : vector<8x32xf32> to vector<8x8xf32>
    %14 = arith.truncf %13 : vector<8x8xf32> to vector<8x8xbf16>
    %c0_8 = arith.constant 0 : index
    %c0_9 = arith.constant 0 : index
    %c0_10 = arith.constant 0 : index
    %15 = vector.load %arg23[%c0_8, %c0_9, %c0_10] : memref<4x8x8xbf16, #tpu.memory_space<vmem>>, vector<1x8x8xbf16>
    %16 = vector.shape_cast %15 : vector<1x8x8xbf16> to vector<8x8xbf16>
    %17 = vector.shape_cast %14 : vector<8x8xbf16> to vector<1x8x8xbf16>
    tpu.vector_store %arg23[%c0_8, %c0_9, %c0_10], %17 {strides = array<i32>} : memref<4x8x8xbf16, #tpu.memory_space<vmem>>, vector<1x8x8xbf16>,
    %18 = vector.extract_strided_slice %12 {offsets = [0, 8], sizes = [8, 8], strides = [1, 1]} : vector<8x32xf32> to vector<8x8xf32>
    %19 = arith.truncf %18 : vector<8x8xf32> to vector<8x8xbf16>
    %c1 = arith.constant 1 : index
    %c0_11 = arith.constant 0 : index
    %c0_12 = arith.constant 0 : index
    %20 = vector.load %arg23[%c1, %c0_11, %c0_12] : memref<4x8x8xbf16, #tpu.memory_space<vmem>>, vector<1x8x8xbf16>
    %21 = vector.shape_cast %20 : vector<1x8x8xbf16> to vector<8x8xbf16>
    %22 = vector.shape_cast %19 : vector<8x8xbf16> to vector<1x8x8xbf16>
    tpu.vector_store %arg23[%c1, %c0_11, %c0_12], %22 {strides = array<i32>} : memref<4x8x8xbf16, #tpu.memory_space<vmem>>, vector<1x8x8xbf16>,
    %23 = vector.extract_strided_slice %12 {offsets = [0, 16], sizes = [8, 8], strides = [1, 1]} : vector<8x32xf32> to vector<8x8xf32>
    %24 = arith.truncf %23 : vector<8x8xf32> to vector<8x8xbf16>
    %c2 = arith.constant 2 : index
    %c0_13 = arith.constant 0 : index
    %c0_14 = arith.constant 0 : index
    %25 = vector.load %arg23[%c2, %c0_13, %c0_14] : memref<4x8x8xbf16, #tpu.memory_space<vmem>>, vector<1x8x8xbf16>
    %26 = vector.shape_cast %25 : vector<1x8x8xbf16> to vector<8x8xbf16>
    %27 = vector.shape_cast %24 : vector<8x8xbf16> to vector<1x8x8xbf16>
    tpu.vector_store %arg23[%c2, %c0_13, %c0_14], %27 {strides = array<i32>} : memref<4x8x8xbf16, #tpu.memory_space<vmem>>, vector<1x8x8xbf16>,
    %28 = vector.extract_strided_slice %12 {offsets = [0, 24], sizes = [8, 8], strides = [1, 1]} : vector<8x32xf32> to vector<8x8xf32>
    %29 = arith.truncf %28 : vector<8x8xf32> to vector<8x8xbf16>
    %c3 = arith.constant 3 : index
    %c0_15 = arith.constant 0 : index
    %c0_16 = arith.constant 0 : index
    %30 = vector.load %arg23[%c3, %c0_15, %c0_16] : memref<4x8x8xbf16, #tpu.memory_space<vmem>>, vector<1x8x8xbf16>
    %31 = vector.shape_cast %30 : vector<1x8x8xbf16> to vector<8x8xbf16>
    %32 = vector.shape_cast %29 : vector<8x8xbf16> to vector<1x8x8xbf16>
    tpu.vector_store %arg23[%c3, %c0_15, %c0_16], %32 {strides = array<i32>} : memref<4x8x8xbf16, #tpu.memory_space<vmem>>, vector<1x8x8xbf16>,
    %c0_17 = arith.constant 0 : index
    %c0_18 = arith.constant 0 : index
    %c0_19 = arith.constant 0 : index
    %33 = vector.load %arg4[%c0_17, %c0_18, %c0_19] : memref<1x1x16xf32, #tpu.memory_space<vmem>>, vector<1x1x16xf32>
    %cst_20 = arith.constant 0.000000e+00 : f32
    %34 = vector.broadcast %cst_20 : f32 to vector<1x1x16xf32>
    %35 = arith.cmpf one, %33, %34 : vector<1x1x16xf32>
    %c0_21 = arith.constant 0 : index
    %c0_22 = arith.constant 0 : index
    %c0_23 = arith.constant 0 : index
    %36 = vector.load %arg23[%c0_21, %c0_22, %c0_23] : memref<4x8x8xbf16, #tpu.memory_space<vmem>>, vector<4x8x8xbf16>
    %c0_24 = arith.constant 0 : index
    %c0_25 = arith.constant 0 : index
    %c0_26 = arith.constant 0 : index
    %37 = vector.load %arg24[%c0_24, %c0_25, %c0_26] : memref<4x16x8xbf16, #tpu.memory_space<vmem>>, vector<4x16x8xbf16>
    "tpu.trace_start"() <{level = 10 : i32, message = "hqd,hkd->hqk"}> : () -> ()
    %cst_27 = arith.constant dense<0.000000e+00> : vector<4x8x16xf32>
    %38 = tpu.matmul %36, %37, %cst_27 {dimension_numbers = #tpu.dot_dimension_numbers<[2], [2], [1], [1], [0, 0, 0, 1, 1, 1], [0], [0]>} : vector<4x8x8xbf16>, vector<4x16x8xbf16>, vector<4x8x16xf32> -> vector<4x8x16xf32>
    %cst_28 = arith.constant -1.000000e+09 : f32
    "tpu.trace_stop"() : () -> ()
    %39 = vector.shape_cast %35 : vector<1x1x16xi1> to vector<1x1x16xi1>
    %40 = vector.broadcast %39 : vector<1x1x16xi1> to vector<4x8x16xi1>
    %41 = vector.broadcast %cst_28 : f32 to vector<4x8x16xf32>
    %42 = arith.select %40, %38, %41 : vector<4x8x16xi1>, vector<4x8x16xf32>
    %cst_29 = arith.constant dense<0xFF800000> : vector<4x8xf32>
    %43 = vector.multi_reduction <maximumf>, %42, %cst_29 [2] : vector<4x8x16xf32> to vector<4x8xf32>
    %44 = vector.shape_cast %43 : vector<4x8xf32> to vector<4x8x1xf32>
    %45 = vector.broadcast %44 : vector<4x8x1xf32> to vector<4x8x16xf32>
    %46 = arith.subf %42, %45 : vector<4x8x16xf32>
    %47 = math.exp %46 : vector<4x8x16xf32>
    %cst_30 = arith.constant dense<0.000000e+00> : vector<4x8xf32>
    %48 = vector.multi_reduction <add>, %47, %cst_30 [2] : vector<4x8x16xf32> to vector<4x8xf32>
    %49 = vector.shape_cast %48 : vector<4x8xf32> to vector<4x8x1xf32>
    %50 = tpu.reciprocal %49 {approx = true} : vector<4x8x1xf32> -> vector<4x8x1xf32>
    %51 = vector.broadcast %50 : vector<4x8x1xf32> to vector<4x8x16xf32>
    %52 = arith.mulf %47, %51 : vector<4x8x16xf32>
    %53 = vector.broadcast %49 : vector<4x8x1xf32> to vector<4x8x16xf32>
    %54 = arith.divf %47, %53 : vector<4x8x16xf32>
    %c0_31 = arith.constant 0 : index
    %c0_32 = arith.constant 0 : index
    %c0_33 = arith.constant 0 : index
    %c0_34 = arith.constant 0 : index
    %55 = vector.load %arg22[%c0_31, %c0_32, %c0_33, %c0_34] : memref<1x4x8x16xf32, #tpu.memory_space<vmem>>, vector<1x4x8x16xf32>
    %56 = vector.shape_cast %55 : vector<1x4x8x16xf32> to vector<4x8x16xf32>
    %57 = vector.shape_cast %54 : vector<4x8x16xf32> to vector<1x4x8x16xf32>
    tpu.vector_store %arg22[%c0_31, %c0_32, %c0_33, %c0_34], %57 {strides = array<i32>} : memref<1x4x8x16xf32, #tpu.memory_space<vmem>>, vector<1x4x8x16xf32>,
    %58 = arith.truncf %52 : vector<4x8x16xf32> to vector<4x8x16xbf16>
    %c0_35 = arith.constant 0 : index
    %c0_36 = arith.constant 0 : index
    %c0_37 = arith.constant 0 : index
    %59 = vector.load %arg25[%c0_35, %c0_36, %c0_37] : memref<4x16x8xbf16, #tpu.memory_space<vmem>>, vector<4x16x8xbf16>
    "tpu.trace_start"() <{level = 10 : i32, message = "hqk,hkd->hqd"}> : () -> ()
    %cst_38 = arith.constant dense<0.000000e+00> : vector<4x8x8xf32>
    %60 = tpu.matmul %58, %59, %cst_38 {dimension_numbers = #tpu.dot_dimension_numbers<[2], [1], [1], [2], [0, 0, 0, 1, 1, 2], [0], [0]>} : vector<4x8x16xbf16>, vector<4x16x8xbf16>, vector<4x8x8xf32> -> vector<4x8x8xf32>
    "tpu.trace_stop"() : () -> ()
    %61 = arith.truncf %60 : vector<4x8x8xf32> to vector<4x8x8xbf16>
    %c0_39 = arith.constant 0 : index
    %c0_40 = arith.constant 0 : index
    %c0_41 = arith.constant 0 : index
    %62 = vector.load %arg11[%c0_39, %c0_40, %c0_41] : memref<4x8x32xbf16, #tpu.memory_space<vmem>>, vector<4x8x32xbf16>
    "tpu.trace_start"() <{level = 10 : i32, message = "hqd,hdm->hqm"}> : () -> ()
    %cst_42 = arith.constant dense<0.000000e+00> : vector<4x8x32xf32>
    %63 = tpu.matmul %61, %62, %cst_42 {dimension_numbers = #tpu.dot_dimension_numbers<[2], [1], [1], [2], [0, 0, 0, 1, 1, 2], [0], [0]>} : vector<4x8x8xbf16>, vector<4x8x32xbf16>, vector<4x8x32xf32> -> vector<4x8x32xf32>
    "tpu.trace_stop"() : () -> ()
    %cst_43 = arith.constant dense<0.000000e+00> : vector<8x32xf32>
    %64 = vector.multi_reduction <add>, %63, %cst_43 [0] : vector<4x8x32xf32> to vector<8x32xf32>
    %c0_44 = arith.constant 0 : index
    %c0_45 = arith.constant 0 : index
    %65 = vector.load %arg12[%c0_44, %c0_45] : memref<1x32xf32, #tpu.memory_space<vmem>>, vector<1x32xf32>
    %66 = vector.broadcast %65 : vector<1x32xf32> to vector<8x32xf32>
    %67 = arith.addf %64, %66 : vector<8x32xf32>
    %68 = arith.addf %67, %4 : vector<8x32xf32>
    %cst_46 = arith.constant dense<0.000000e+00> : vector<8xf32>
    %69 = vector.multi_reduction <add>, %68, %cst_46 [1] : vector<8x32xf32> to vector<8xf32>
    %70 = vector.shape_cast %69 : vector<8xf32> to vector<8x1xf32>
    %cst_47 = arith.constant 3.200000e+01 : f32
    %71 = vector.broadcast %cst_47 : f32 to vector<8x1xf32>
    %72 = arith.divf %70, %71 : vector<8x1xf32>
    %73 = vector.broadcast %72 : vector<8x1xf32> to vector<8x32xf32>
    %74 = arith.subf %68, %73 : vector<8x32xf32>
    %75 = arith.mulf %74, %74 : vector<8x32xf32>
    %cst_48 = arith.constant dense<0.000000e+00> : vector<8xf32>
    %76 = vector.multi_reduction <add>, %75, %cst_48 [1] : vector<8x32xf32> to vector<8xf32>
    %77 = vector.shape_cast %76 : vector<8xf32> to vector<8x1xf32>
    %cst_49 = arith.constant 3.200000e+01 : f32
    %78 = vector.broadcast %cst_49 : f32 to vector<8x1xf32>
    %79 = arith.divf %77, %78 : vector<8x1xf32>
    %80 = vector.broadcast %72 : vector<8x1xf32> to vector<8x32xf32>
    %81 = arith.subf %68, %80 : vector<8x32xf32>
    %cst_50 = arith.constant 9.99999974E-6 : f32
    %82 = vector.broadcast %cst_50 : f32 to vector<8x1xf32>
    %83 = arith.addf %79, %82 : vector<8x1xf32>
    %84 = math.rsqrt %83 : vector<8x1xf32>
    %85 = vector.broadcast %84 : vector<8x1xf32> to vector<8x32xf32>
    %86 = arith.mulf %81, %85 : vector<8x32xf32>
    %c0_51 = arith.constant 0 : index
    %c0_52 = arith.constant 0 : index
    %87 = vector.load %arg13[%c0_51, %c0_52] : memref<1x32xf32, #tpu.memory_space<vmem>>, vector<1x32xf32>
    %88 = vector.broadcast %87 : vector<1x32xf32> to vector<8x32xf32>
    %89 = arith.mulf %86, %88 : vector<8x32xf32>
    %c0_53 = arith.constant 0 : index
    %c0_54 = arith.constant 0 : index
    %90 = vector.load %arg14[%c0_53, %c0_54] : memref<1x32xf32, #tpu.memory_space<vmem>>, vector<1x32xf32>
    %91 = vector.broadcast %90 : vector<1x32xf32> to vector<8x32xf32>
    %92 = arith.addf %89, %91 : vector<8x32xf32>
    %93 = arith.truncf %92 : vector<8x32xf32> to vector<8x32xbf16>
    %c0_55 = arith.constant 0 : index
    %c0_56 = arith.constant 0 : index
    %94 = vector.load %arg15[%c0_55, %c0_56] : memref<32x64xbf16, #tpu.memory_space<vmem>>, vector<32x64xbf16>
    %cst_57 = arith.constant dense<0.000000e+00> : vector<8x64xf32>
    %95 = tpu.matmul %93, %94, %cst_57 {dimension_numbers = #tpu.dot_dimension_numbers<[1], [0], [0], [1], [0, 0, 1, 1], [], []>} : vector<8x32xbf16>, vector<32x64xbf16>, vector<8x64xf32> -> vector<8x64xf32>
    %c0_58 = arith.constant 0 : index
    %c0_59 = arith.constant 0 : index
    %96 = vector.load %arg16[%c0_58, %c0_59] : memref<1x64xf32, #tpu.memory_space<vmem>>, vector<1x64xf32>
    %97 = vector.broadcast %96 : vector<1x64xf32> to vector<8x64xf32>
    %98 = arith.addf %95, %97 : vector<8x64xf32>
    %cst_60 = arith.constant 0.000000e+00 : f32
    %99 = vector.broadcast %cst_60 : f32 to vector<8x64xf32>
    %100 = arith.maximumf %98, %99 : vector<8x64xf32>
    %101 = arith.truncf %100 : vector<8x64xf32> to vector<8x64xbf16>
    %c0_61 = arith.constant 0 : index
    %c0_62 = arith.constant 0 : index
    %102 = vector.load %arg17[%c0_61, %c0_62] : memref<64x32xbf16, #tpu.memory_space<vmem>>, vector<64x32xbf16>
    %cst_63 = arith.constant dense<0.000000e+00> : vector<8x32xf32>
    %103 = tpu.matmul %101, %102, %cst_63 {dimension_numbers = #tpu.dot_dimension_numbers<[1], [0], [0], [1], [0, 0, 1, 1], [], []>} : vector<8x64xbf16>, vector<64x32xbf16>, vector<8x32xf32> -> vector<8x32xf32>
    %c0_64 = arith.constant 0 : index
    %c0_65 = arith.constant 0 : index
    %104 = vector.load %arg18[%c0_64, %c0_65] : memref<1x32xf32, #tpu.memory_space<vmem>>, vector<1x32xf32>
    %105 = vector.broadcast %104 : vector<1x32xf32> to vector<8x32xf32>
    %106 = arith.addf %103, %105 : vector<8x32xf32>
    %107 = arith.addf %106, %92 : vector<8x32xf32>
    %cst_66 = arith.constant dense<0.000000e+00> : vector<8xf32>
    %108 = vector.multi_reduction <add>, %107, %cst_66 [1] : vector<8x32xf32> to vector<8xf32>
    %109 = vector.shape_cast %108 : vector<8xf32> to vector<8x1xf32>
    %cst_67 = arith.constant 3.200000e+01 : f32
    %110 = vector.broadcast %cst_67 : f32 to vector<8x1xf32>
    %111 = arith.divf %109, %110 : vector<8x1xf32>
    %112 = vector.broadcast %111 : vector<8x1xf32> to vector<8x32xf32>
    %113 = arith.subf %107, %112 : vector<8x32xf32>
    %114 = arith.mulf %113, %113 : vector<8x32xf32>
    %cst_68 = arith.constant dense<0.000000e+00> : vector<8xf32>
    %115 = vector.multi_reduction <add>, %114, %cst_68 [1] : vector<8x32xf32> to vector<8xf32>
    %116 = vector.shape_cast %115 : vector<8xf32> to vector<8x1xf32>
    %cst_69 = arith.constant 3.200000e+01 : f32
    %117 = vector.broadcast %cst_69 : f32 to vector<8x1xf32>
    %118 = arith.divf %116, %117 : vector<8x1xf32>
    %119 = vector.broadcast %111 : vector<8x1xf32> to vector<8x32xf32>
    %120 = arith.subf %107, %119 : vector<8x32xf32>
    %cst_70 = arith.constant 9.99999974E-6 : f32
    %121 = vector.broadcast %cst_70 : f32 to vector<8x1xf32>
    %122 = arith.addf %118, %121 : vector<8x1xf32>
    %123 = math.rsqrt %122 : vector<8x1xf32>
    %124 = vector.broadcast %123 : vector<8x1xf32> to vector<8x32xf32>
    %125 = arith.mulf %120, %124 : vector<8x32xf32>
    %c0_71 = arith.constant 0 : index
    %c0_72 = arith.constant 0 : index
    %126 = vector.load %arg19[%c0_71, %c0_72] : memref<1x32xf32, #tpu.memory_space<vmem>>, vector<1x32xf32>
    %127 = vector.broadcast %126 : vector<1x32xf32> to vector<8x32xf32>
    %128 = arith.mulf %125, %127 : vector<8x32xf32>
    %c0_73 = arith.constant 0 : index
    %c0_74 = arith.constant 0 : index
    %129 = vector.load %arg20[%c0_73, %c0_74] : memref<1x32xf32, #tpu.memory_space<vmem>>, vector<1x32xf32>
    %130 = vector.broadcast %129 : vector<1x32xf32> to vector<8x32xf32>
    %131 = arith.addf %128, %130 : vector<8x32xf32>
    %c0_75 = arith.constant 0 : index
    %c0_76 = arith.constant 0 : index
    %c0_77 = arith.constant 0 : index
    %132 = vector.load %arg21[%c0_75, %c0_76, %c0_77] : memref<1x8x32xf32, #tpu.memory_space<vmem>>, vector<1x8x32xf32>
    %133 = vector.shape_cast %132 : vector<1x8x32xf32> to vector<8x32xf32>
    %134 = vector.shape_cast %131 : vector<8x32xf32> to vector<1x8x32xf32>
    tpu.vector_store %arg21[%c0_75, %c0_76, %c0_77], %134 {strides = array<i32>} : memref<1x8x32xf32, #tpu.memory_space<vmem>>, vector<1x8x32xf32>,
    return
  }
  func.func @transform_0(%arg0: i32, %arg1: i32) -> (i32, i32, i32) {
    %c0_i32 = arith.constant 0 : i32
    %c0_i32_0 = arith.constant 0 : i32
    return %arg0, %arg1, %c0_i32 : i32, i32, i32
  }
  func.func @transform_1(%arg0: i32, %arg1: i32) -> (i32, i32, i32) {
    %c0_i32 = arith.constant 0 : i32
    %c0_i32_0 = arith.constant 0 : i32
    %c0_i32_1 = arith.constant 0 : i32
    return %arg0, %c0_i32, %c0_i32_0 : i32, i32, i32
  }
  func.func @transform_2(%arg0: i32, %arg1: i32) -> (i32, i32, i32) {
    %c0_i32 = arith.constant 0 : i32
    %c0_i32_0 = arith.constant 0 : i32
    %c0_i32_1 = arith.constant 0 : i32
    return %arg0, %c0_i32, %c0_i32_0 : i32, i32, i32
  }
  func.func @transform_3(%arg0: i32, %arg1: i32) -> (i32, i32) {
    %c0_i32 = arith.constant 0 : i32
    %c0_i32_0 = arith.constant 0 : i32
    %c0_i32_1 = arith.constant 0 : i32
    return %c0_i32, %c0_i32_0 : i32, i32
  }
  func.func @transform_4(%arg0: i32, %arg1: i32) -> (i32, i32) {
    %c0_i32 = arith.constant 0 : i32
    %c0_i32_0 = arith.constant 0 : i32
    %c0_i32_1 = arith.constant 0 : i32
    return %c0_i32, %c0_i32_0 : i32, i32
  }
  func.func @transform_5(%arg0: i32, %arg1: i32) -> (i32, i32) {
    %c0_i32 = arith.constant 0 : i32
    %c0_i32_0 = arith.constant 0 : i32
    %c0_i32_1 = arith.constant 0 : i32
    return %c0_i32, %c0_i32_0 : i32, i32
  }
  func.func @transform_6(%arg0: i32, %arg1: i32) -> (i32, i32) {
    %c0_i32 = arith.constant 0 : i32
    %c0_i32_0 = arith.constant 0 : i32
    %c0_i32_1 = arith.constant 0 : i32
    return %c0_i32, %c0_i32_0 : i32, i32
  }
  func.func @transform_7(%arg0: i32, %arg1: i32) -> (i32, i32) {
    %c0_i32 = arith.constant 0 : i32
    %c0_i32_0 = arith.constant 0 : i32
    %c0_i32_1 = arith.constant 0 : i32
    return %c0_i32, %c0_i32_0 : i32, i32
  }
  func.func @transform_8(%arg0: i32, %arg1: i32) -> (i32, i32) {
    %c0_i32 = arith.constant 0 : i32
    %c0_i32_0 = arith.constant 0 : i32
    %c0_i32_1 = arith.constant 0 : i32
    return %c0_i32, %c0_i32_0 : i32, i32
  }
  func.func @transform_9(%arg0: i32, %arg1: i32) -> (i32, i32, i32) {
    %c0_i32 = arith.constant 0 : i32
    %c0_i32_0 = arith.constant 0 : i32
    %c0_i32_1 = arith.constant 0 : i32
    %c0_i32_2 = arith.constant 0 : i32
    return %c0_i32, %c0_i32_0, %c0_i32_1 : i32, i32, i32
  }
  func.func @transform_10(%arg0: i32, %arg1: i32) -> (i32, i32) {
    %c0_i32 = arith.constant 0 : i32
    %c0_i32_0 = arith.constant 0 : i32
    %c0_i32_1 = arith.constant 0 : i32
    return %c0_i32, %c0_i32_0 : i32, i32
  }
  func.func @transform_11(%arg0: i32, %arg1: i32) -> (i32, i32) {
    %c0_i32 = arith.constant 0 : i32
    %c0_i32_0 = arith.constant 0 : i32
    %c0_i32_1 = arith.constant 0 : i32
    return %c0_i32, %c0_i32_0 : i32, i32
  }
  func.func @transform_12(%arg0: i32, %arg1: i32) -> (i32, i32) {
    %c0_i32 = arith.constant 0 : i32
    %c0_i32_0 = arith.constant 0 : i32
    %c0_i32_1 = arith.constant 0 : i32
    return %c0_i32, %c0_i32_0 : i32, i32
  }
  func.func @transform_13(%arg0: i32, %arg1: i32) -> (i32, i32) {
    %c0_i32 = arith.constant 0 : i32
    %c0_i32_0 = arith.constant 0 : i32
    %c0_i32_1 = arith.constant 0 : i32
    return %c0_i32, %c0_i32_0 : i32, i32
  }
  func.func @transform_14(%arg0: i32, %arg1: i32) -> (i32, i32) {
    %c0_i32 = arith.constant 0 : i32
    %c0_i32_0 = arith.constant 0 : i32
    %c0_i32_1 = arith.constant 0 : i32
    return %c0_i32, %c0_i32_0 : i32, i32
  }
  func.func @transform_15(%arg0: i32, %arg1: i32) -> (i32, i32) {
    %c0_i32 = arith.constant 0 : i32
    %c0_i32_0 = arith.constant 0 : i32
    %c0_i32_1 = arith.constant 0 : i32
    return %c0_i32, %c0_i32_0 : i32, i32
  }
  func.func @transform_16(%arg0: i32, %arg1: i32) -> (i32, i32) {
    %c0_i32 = arith.constant 0 : i32
    %c0_i32_0 = arith.constant 0 : i32
    %c0_i32_1 = arith.constant 0 : i32
    return %c0_i32, %c0_i32_0 : i32, i32
  }
  func.func @transform_17(%arg0: i32, %arg1: i32) -> (i32, i32) {
    %c0_i32 = arith.constant 0 : i32
    %c0_i32_0 = arith.constant 0 : i32
    %c0_i32_1 = arith.constant 0 : i32
    return %c0_i32, %c0_i32_0 : i32, i32
  }
  func.func @transform_18(%arg0: i32, %arg1: i32) -> (i32, i32) {
    %c0_i32 = arith.constant 0 : i32
    %c0_i32_0 = arith.constant 0 : i32
    %c0_i32_1 = arith.constant 0 : i32
    return %c0_i32, %c0_i32_0 : i32, i32
  }
  func.func @transform_19(%arg0: i32, %arg1: i32) -> (i32, i32, i32) {
    %c0_i32 = arith.constant 0 : i32
    %c0_i32_0 = arith.constant 0 : i32
    return %arg0, %arg1, %c0_i32 : i32, i32, i32
  }
  func.func @transform_20(%arg0: i32, %arg1: i32) -> (i32, i32, i32, i32) {
    %c0_i32 = arith.constant 0 : i32
    %c0_i32_0 = arith.constant 0 : i32
    %c0_i32_1 = arith.constant 0 : i32
    return %arg0, %c0_i32, %arg1, %c0_i32_0 : i32, i32, i32, i32
  }
}

</mosaic_0001>

<bundles_post_ra>
// kernel: tpu_custom_call.1
= control target key start
LH: loop header
LB: loop body
LE: loop exit
PB: predicated region body
PF: predicated region fallthrough
CT: control target
= control target key end

     0   :  { %s3804_s0 = inlined_call_operand.vmem [shape: f32[2,16,32], index: 0, kind: input, shape index: {}]   ;;  %s3805_s1 = inlined_call_operand.vmem [shape: bf16[2,16,32], index: 1, kind: input, shape index: {}]   ;;  %s3806_s2 = inlined_call_operand.hbm [shape: f32[2,1,16], index: 2, kind: input, shape index: {}]   ;;  %s3807_s3 = inlined_call_operand.hbm [shape: bf16[32,32], index: 3, kind: input, shape index: {}]   ;;  %s3808_s4 = inlined_call_operand.hbm [shape: f32[1,32], index: 4, kind: input, shape index: {}]   ;;  %s3809_s5 = inlined_call_operand.hbm [shape: bf16[32,32], index: 5, kind: input, shape index: {}]   ;;  %s3810_s6 = inlined_call_operand.hbm [shape: f32[1,32], index: 6, kind: input, shape index: {}]   ;;  %s3811_s7 = inlined_call_operand.hbm [shape: bf16[32,32], index: 7, kind: input, shape index: {}]   ;;  %s3812_s8 = inlined_call_operand.hbm [shape: f32[1,32], index: 8, kind: input, shape index: {}]   ;;  %s3813_s9 = inlined_call_operand.vmem [shape: bf16[4,8,32], index: 9, kind: input, shape index: {}]   ;;  %s3814_s10 = inlined_call_operand.vmem [shape: f32[1,32], index: 10, kind: input, shape index: {}]   ;;  %s3815_s11 = inlined_call_operand.vmem [shape: f32[1,32], index: 11, kind: input, shape index: {}]   ;;  %s3816_s12 = inlined_call_operand.vmem [shape: f32[1,32], index: 12, kind: input, shape index: {}]   ;;  %s3817_s13 = inlined_call_operand.hbm [shape: bf16[32,64], index: 13, kind: input, shape index: {}]   ;;  %s3818_s14 = inlined_call_operand.vmem [shape: f32[1,64], index: 14, kind: input, shape index: {}]   ;;  %s3819_s15 = inlined_call_operand.vmem [shape: bf16[64,32], index: 15, kind: input, shape index: {}]   ;;  %s3820_s16 = inlined_call_operand.vmem [shape: f32[1,32], index: 16, kind: input, shape index: {}]   ;;  %s3821_s17 = inlined_call_operand.vmem [shape: f32[1,32], index: 17, kind: input, shape index: {}]   ;;  %s3822_s18 = inlined_call_operand.vmem [shape: f32[1,32], index: 18, kind: input, shape index: {}]   ;;  %s3823_s19 = inlined_call_operand.hbm [shape: f32[2,16,32], index: 19, kind: output, shape index: {0}]   ;;  %s3824_s20 = inlined_call_operand.hbm [shape: f32[2,4,16,16], index: 20, kind: output, shape index: {1}]  }
   0x1   :  { %3838 = sst [smem:[#allocation34_spill]] %s3804_s0 }
   0x2   :  { %3839 = sst [smem:[#allocation35_spill]] %s3805_s1 }
   0x3   :  { %3840 = sst [smem:[#allocation36_spill]] %s3806_s2 }
   0x4   :  { %3841 = sst [smem:[#allocation37_spill]] %s3807_s3 }
   0x5   :  { %3842 = sst [smem:[#allocation38_spill]] %s3808_s4 }
   0x6   :  { %3843 = sst [smem:[#allocation39_spill]] %s3809_s5 }
   0x7   :  { %3844 = sst [smem:[#allocation40_spill]] %s3810_s6 }
   0x8   :  { %3845 = sst [smem:[#allocation41_spill]] %s3811_s7 }
   0x9   :  { %3846 = sst [smem:[#allocation42_spill]] %s3812_s8 }
   0xa   :  { %3847 = sst [smem:[#allocation43_spill]] %s3813_s9 }
   0xb   :  { %3848 = sst [smem:[#allocation44_spill]] %s3814_s10 }
   0xc   :  { %3849 = sst [smem:[#allocation45_spill]] %s3815_s11 }
   0xd   :  { %3850 = sst [smem:[#allocation46_spill]] %s3816_s12 }
   0xe   :  { %3851 = sst [smem:[#allocation47_spill]] %s3817_s13 }
   0xf   :  { %3852 = sst [smem:[#allocation48_spill]] %s3818_s14 }
  0x10   :  { %3853 = sst [smem:[#allocation49_spill]] %s3819_s15 }
  0x11   :  { %3854 = sst [smem:[#allocation50_spill]] %s3820_s16 }
  0x12   :  { %3855 = sst [smem:[#allocation51_spill]] %s3821_s17 }
  0x13   :  { %3856 = sst [smem:[#allocation52_spill]] %s3822_s18 }
  0x14   :  { %3857 = sst [smem:[#allocation53_spill]] %s3823_s19 }
  0x15   :  { %3858 = sst [smem:[#allocation54_spill]] %s3824_s20 }
  0x16   :  { %26 = vsyncpa [#allocation6], 0 }
  0x17   :  { %28 = vsyncpa [#allocation6 + $0x1], 0 }
  0x18   :  { %29 = vsyncpa [#allocation9], 0 }
  0x19   :  { %30 = vsyncpa [#allocation12], 0 }
  0x1a   :  { %31 = vsyncpa [#allocation15], 0 }
  0x1b   :  { %32 = vsyncpa [#allocation18], 0 }
  0x1c   :  { %33 = vsyncpa [#allocation7], 0 }
  0x1d   :  { %35 = vsyncpa [#allocation7 + $0x1], 0 }
  0x1e   :  { %36 = vsyncpa [#allocation21], 0 }
  0x1f   :  { %38 = vsyncpa [#allocation21 + $0x1], 0  ;;  %s3286_s1 = smov 0   ;;  %s3288_s22 = smov 0  }
  0x20   :  { %s3290_s23 = smov 0   ;;  %s3292_s24 = smov 0  }
  0x21   :  { %s3294_s2 = smov 0   ;;  %s3296_s25 = smov 0  }
  0x22   :  { %s3298_s3 = smov 0   ;;  %s3300_s26 = smov 0  }
  0x23   :  { %s3302_s27 = smov 0   ;;  %s3304_s28 = smov 0  }
  0x24   :  { %s3306_s4 = smov 0  }
  0x25 LB: > { %3859 = sst [smem:[#allocation29_spill]] %s3145_s27  ;;  %s3826_s29 = sadd.s32 4294967295, %s3153_s4   ;;  %s3153_s4 = sphi %s3306_s4, %s44_s4   ;;  %s3149_s28 = sphi %s3304_s28, %s3904_s28   ;;  %s3145_s27 = sphi %s3302_s27, %s3903_s27   ;;  %s3141_s26 = sphi %s3300_s26, %s3902_s26   ;;  %s3137_s3 = sphi %s3298_s3, %s3901_s3   ;;  %s3133_s25 = sphi %s3296_s25, %s3910_s25   ;;  %s3129_s2 = sphi %s3294_s2, %s3909_s2   ;;  %s3125_s24 = sphi %s3292_s24, %s3908_s24   ;;  %s3121_s23 = sphi %s3290_s23, %s3907_s23   ;;  %s3117_s22 = sphi %s3288_s22, %s3906_s22   ;;  %s3113_s1 = sphi %s3286_s1, %s3905_s1  }
  0x26   : > { %3860 = sst [smem:[#allocation30_spill]] %s3149_s28  ;;  %p2293_p0 = scmp.ge.s32.totalorder %s3153_s4, 1 }
  0x27   : > { %p3345_p1 = scmp.eq.s32.totalorder %s3826_s29, 0  ;;  %p533_p2 = scmp.lt.s32.totalorder %s3153_s4, 5 }
  0x28   : > { %s3155_s21 = smov [#allocation8]   ;;  %s3156_s29 = smov [#allocation11]  }
  0x29   : > { %s3861_s30 = scalar_select %p3345_p1, 1, 0 }
  0x2a   : > { %p3350_p3 = pnand %p2293_p0, %p533_p2  ;;  %s545_s19 = sshll.u32 %s3155_s21, 4  ;;  %s546_s19 = int_to_ptr.vmem [resolvable:$true] %s545_s19 }
  0x2b   : > { %s569_s17 = sshll.u32 %s3156_s29, 4  ;;  %s3157_s20 = smov [#allocation14]   ;;  %s570_s17 = int_to_ptr.vmem [resolvable:$true] %s569_s17 }
  0x2c   : > { %s3862_s0 = scalar_select %p3350_p3, 1, 0 }
  0x2d   : > { %p2576_p4 = pneg %p3350_p3  ;;  %s593_s16 = sshll.u32 %s3157_s20, 4  ;;  %s594_s16 = int_to_ptr.vmem [resolvable:$true] %s593_s16 }
  0x2e   : > { %s2788_s21 = scalar_lea.vmem %s546_s19, 256  ;;  %p2796_p10 = scmp.lt.s32.totalorder %s546_s19, %s546_s19 }
  0x2f   : > { %p3358_p5 = pnand %p2576_p4, %p3345_p1  ;;  %p2789_p7 = scmp.ne.s32.totalorder %s546_s19, %s2788_s21 }
  0x30   : > { %p2797_p11 = scmp.lt.s32.totalorder %s2788_s21, %s2788_s21 }
  0x31   : > { %p3364_p6 = pneg %p3358_p5 }
  0x32   : > { %p2798_p12 = por %p2797_p11, %p2796_p10 }
  0x33   : > { %p2791_p8 = pnand %p2789_p7, %p3364_p6 }
  0x35   : > { %p2792_p9 = pneg %p2791_p8 }
  0x37   : > { %p2799_p13 = pnand %p2798_p12, %p2792_p9 }
  0x39   : > { %2802 = shalt.err (!%p2799_p13)
}
  0x3a   : > { %s3831_s29 = smov 64   ;;  %s3159_s20 = smov 4  }
  0x3b   : > { %s3865_s15 = sld [smem:[#allocation37_spill]]  ;;  %s2814_s10 = scalar_lea.vmem %s570_s17, 256 }
  0x3c   : > { %p2815_p0 = scmp.ne.s32.totalorder %s570_s17, %s2814_s10  ;;  %p2822_p7 = scmp.lt.s32.totalorder %s570_s17, %s570_s17 }
  0x3d   : > { %p2823_p8 = scmp.lt.s32.totalorder %s2814_s10, %s2814_s10 }
  0x3e   : > { %p2817_p2 = pnand %p2815_p0, %p3364_p6 }
  0x3f   : > { %p2824_p9 = por %p2823_p8, %p2822_p7 }
  0x40   : > { %p2818_p4 = pneg %p2817_p2 }
  0x41   : > { %2579 = dma.hbm_to_vmem [thread:$0]  (!%p3358_p5), %s3865_s15, 256, %s546_s19, [#allocation9], %s3831_s29, %s3831_s29, %s3159_s20  }
  0x42   : > { %p2825_p10 = pnand %p2824_p9, %p2818_p4 }
  0x44   : > { %2828 = shalt.err (!%p2825_p10)
}
  0x45   : > { %s3866_s5 = sld [smem:[#allocation39_spill]]  ;;  %s2840_s11 = scalar_lea.vmem %s594_s16, 256 }
  0x46   : > { %p2841_p11 = scmp.ne.s32.totalorder %s594_s16, %s2840_s11  ;;  %p2848_p0 = scmp.lt.s32.totalorder %s594_s16, %s594_s16 }
  0x47   : > { %p2849_p2 = scmp.lt.s32.totalorder %s2840_s11, %s2840_s11 }
  0x48   : > { %p2843_p12 = pnand %p2841_p11, %p3364_p6 }
  0x49   : > { %p2850_p4 = por %p2849_p2, %p2848_p0 }
  0x4a   : > { %p2844_p13 = pneg %p2843_p12 }
  0x4b   : > { %2585 = dma.hbm_to_vmem [thread:$0]  (!%p3358_p5), %s3866_s5, 256, %s570_s17, [#allocation12], %s3831_s29, %s3831_s29, %s3159_s20  }
  0x4c   : > { %p2851_p7 = pnand %p2850_p4, %p2844_p13 }
  0x4e   : > { %2854 = shalt.err (!%p2851_p7)
}
  0x4f   : > { %s3867_s7 = sld [smem:[#allocation41_spill]]  ;;  %s3160_s12 = smov [#allocation10]  }
  0x50   : > { %s559_s15 = sshll.u32 %s3160_s12, 4  ;;  %s3161_s17 = smov [#allocation13]   ;;  %s560_s15 = int_to_ptr.vmem [resolvable:$true] %s559_s15 }
  0x51   : > { %s583_s19 = sshll.u32 %s3161_s17, 4  ;;  %s2866_s21 = scalar_lea.vmem %s560_s15, 16  ;;  %s584_s19 = int_to_ptr.vmem [resolvable:$true] %s583_s19 }
  0x52   : > { %p2867_p8 = scmp.ne.s32.totalorder %s560_s15, %s2866_s21  ;;  %s2873_s11 = scalar_lea.vmem %s560_s15, 32 }
  0x53   : > { %p2874_p11 = scmp.lt.s32.totalorder %s560_s15, %s560_s15  ;;  %p2875_p12 = scmp.lt.s32.totalorder %s2873_s11, %s2866_s21 }
  0x54   : > { %p2869_p9 = pnand %p2867_p8, %p3364_p6 }
  0x55   : > { %2591 = dma.hbm_to_vmem [thread:$0]  (!%p3358_p5), %s3867_s7, 256, %s594_s16, [#allocation15], %s3831_s29, %s3831_s29, %s3159_s20  }
  0x56   : > { %p2870_p10 = pneg %p2869_p9  ;;  %p2876_p13 = por %p2875_p12, %p2874_p11 }
  0x58   : > { %p2877_p0 = pnand %p2876_p13, %p2870_p10 }
  0x5a   : > { %2880 = shalt.err (!%p2877_p0)
}
  0x5b   : > { %s3868_s9 = sld [smem:[#allocation38_spill]]  ;;  %s2892_s12 = scalar_lea.vmem %s584_s19, 16 }
  0x5c   : > { %p2893_p2 = scmp.ne.s32.totalorder %s584_s19, %s2892_s12  ;;  %s2899_s17 = scalar_lea.vmem %s584_s19, 32 }
  0x5d   : > { %p2900_p8 = scmp.lt.s32.totalorder %s584_s19, %s584_s19  ;;  %p2901_p9 = scmp.lt.s32.totalorder %s2899_s17, %s2892_s12 }
  0x5e   : > { %p2895_p4 = pnand %p2893_p2, %p3364_p6 }
  0x5f   : > { %p2902_p3 = por %p2901_p9, %p2900_p8 }
  0x60   : > { %p2896_p7 = pneg %p2895_p4 }
  0x61   : > { %2582 = dma.hbm_to_vmem [thread:$0]  (!%p3358_p5), %s3868_s9, 16, %s560_s15, [#allocation9]  }
  0x62   : > { %p2903_p11 = pnand %p2902_p3, %p2896_p7 }
  0x64   : > { %2906 = shalt.err (!%p2903_p11)
}
  0x65   : > { %s3869_s6 = sld [smem:[#allocation40_spill]]  ;;  %s3162_s15 = smov [#allocation16]  }
  0x66   : > { %s607_s10 = sshll.u32 %s3162_s15, 4  ;;  %s3163_s16 = smov [#allocation17]   ;;  %s608_s10 = int_to_ptr.vmem [resolvable:$true] %s607_s10 }
  0x67   : > { %s629_s9 = sshll.u32 %s3163_s16, 4  ;;  %s2918_s29 = scalar_lea.vmem %s608_s10, 16  ;;  %s630_s9 = int_to_ptr.vmem [resolvable:$true] %s629_s9 }
  0x68   : > { %p2919_p10 = scmp.ne.s32.totalorder %s608_s10, %s2918_s29  ;;  %s2925_s12 = scalar_lea.vmem %s608_s10, 32 }
  0x69   : > { %p2926_p3 = scmp.lt.s32.totalorder %s608_s10, %s608_s10  ;;  %p2927_p0 = scmp.lt.s32.totalorder %s2925_s12, %s2918_s29 }
  0x6a   : > { %p2921_p12 = pnand %p2919_p10, %p3364_p6 }
  0x6b   : > { %2588 = dma.hbm_to_vmem [thread:$0]  (!%p3358_p5), %s3869_s6, 16, %s584_s19, [#allocation12]  }
  0x6c   : > { %p2922_p13 = pneg %p2921_p12  ;;  %p2928_p2 = por %p2927_p0, %p2926_p3 }
  0x6e   : > { %p2929_p4 = pnand %p2928_p2, %p2922_p13 }
  0x70   : > { %2932 = shalt.err (!%p2929_p4)
}
  0x71   : > { %s3870_s8 = sld [smem:[#allocation42_spill]]  ;;  %s2944_s21 = scalar_lea.vmem %s630_s9, 256 }
  0x72   : > { %p2945_p7 = scmp.ne.s32.totalorder %s630_s9, %s2944_s21  ;;  %p2952_p11 = scmp.lt.s32.totalorder %s630_s9, %s630_s9 }
  0x73   : > { %p2953_p10 = scmp.lt.s32.totalorder %s2944_s21, %s2944_s21 }
  0x74   : > { %p2947_p8 = pnand %p2945_p7, %p3364_p6 }
  0x75   : > { %p2954_p12 = por %p2953_p10, %p2952_p11 }
  0x76   : > { %p2948_p9 = pneg %p2947_p8 }
  0x77   : > { %2594 = dma.hbm_to_vmem [thread:$0]  (!%p3358_p5), %s3870_s8, 16, %s608_s10, [#allocation15]  }
  0x78   : > { %p2955_p1 = pnand %p2954_p12, %p2948_p9 }
  0x7a   : > { %2958 = shalt.err (!%p2955_p1)
}
  0x7b   : > { %s3871_s29 = smov 64   ;;  %s3872_s13 = sld [smem:[#allocation47_spill]] }
  0x7c   : > { %s2292_s14 = sadd.s32 4294967294, %s3153_s4   ;;  %s53_s18 = sadd.s32 1, %s3145_s27 }
  0x7d   : > { %s56_s10 = sadd.s32 1, %s3149_s28  ;;  %p54_p1 = scmp.ge.s32.totalorder %s53_s18, 2 }
  0x7e   : > { %s117_s16 = sadd.s32 1, %s3133_s25  ;;  %p124_p6 = scmp.ne.s32.totalorder %s3133_s25, %s3129_s2 }
  0x7f   : > { %p125_p13 = scmp.eq.s32.totalorder %s3153_s4, 0  ;;  %s3912_s18 = smov (%p54_p1, %s53_s18), 0 }
  0x80   : > { %3873 = sst [smem:[#allocation31_spill]] %s3912_s18  ;;  %s3914_s10 = smov (!%p54_p1, %s56_s10), %s3149_s28 }
  0x81   : > { %2597 = dma.hbm_to_vmem [thread:$0]  (!%p3358_p5), %s3872_s13, 256, %s630_s9, [#allocation18], %s3871_s29, %s3871_s29, %s3159_s20  }
  0x82   : > { %p3439_p3 = por %p125_p13, %p124_p6  ;;  %p130_p5 = scmp.ne.s32.totalorder %s3129_s2, %s3125_s24 }
  0x83   : > { %p58_p0 = scmp.ge.s32.totalorder %s3914_s10, 2  ;;  %s477_s9 = ssub.s32 %s3145_s27, %s3912_s18 }
  0x84   : > { %p3875_p2 = scmp.ne.s32.totalorder %s3861_s30, 0  ;;  %s481_s17 = sadd.s32 1, %s3121_s23 }
  0x85   : > { %s3916_s10 = smov (%p58_p0, %s3914_s10), 0  ;;  %p491_p7 = scmp.ne.s32.totalorder %s3121_s23, %s3117_s22 }
  0x86   : > { %p3449_p4 = por %p3875_p2, %p130_p5  ;;  %3877 = sst [smem:[#allocation32_spill]] %s3916_s10 }
  0x87   : > { %s3878_s19 = sadd.s32 4294967295, %s3153_s4   ;;  %s114_s21 = ssub.s32 %s3149_s28, %s3916_s10 }
  0x88   : > { %p492_p8 = scmp.eq.s32.totalorder %s3878_s19, 3  ;;  %p497_p9 = scmp.ne.s32.totalorder %s3117_s22, %s3113_s1 }
  0x89   : > { %p115_p11 = scmp.eq.s32.totalorder %s114_s21, 0  ;;  %s478_s24 = sor.u32 %s477_s9, %s114_s21 }
  0x8a   : > { %p479_p10 = scmp.eq.s32.totalorder %s478_s24, 0  ;;  %p3464_p12 = por %p492_p8, %p491_p7 }
  0x8b   : > { %s3469_s11 = scalar_select %p115_p11, %s3133_s25, %s117_s16  }
  0x8c   : > { %s3472_s15 = scalar_select %p479_p10, %s3121_s23, %s481_s17  }
  0x8d   : > { %3880 = sst [smem:[#allocation33_spill]] %s3469_s11  ;;  %p498_p1 = scmp.eq.s32.totalorder %s2292_s14, 3 }
  0x8e   : > { %p2616_p6 = scmp.lt.s32.totalorder %s3153_s4, 4  ;;  %s677_s5 = sand.u32 1, %s3133_s25  }
  0x8f   : > { %s2302_s6 = sshll.u32 %s3149_s28, 4  ;;  %p3477_p13 = por %p498_p1, %p497_p9 }
  0x90   : > { %s3882_s9 = sld [smem:[#allocation36_spill]]  ;;  %s680_s24 = scalar_lea.vmem [#allocation5], %s677_s5 }
  0x91   : > { %s687_s13 = sshll.u32 %s680_s24, 4  ;;  %p3486_p5 = pnand %p2616_p6, %p3439_p3  ;;  %s688_s13 = int_to_ptr.vmem [resolvable:$true] %s687_s13 }
  0x92   : > { %s678_s14 = scalar_lea.sflag [#allocation6], %s677_s5  ;;  %s2972_s17 = scalar_lea.vmem %s688_s13, 16 }
  0x93   : > { %p2961_p0 = pneg %p3486_p5  ;;  %p2973_p2 = scmp.ne.s32.totalorder %s688_s13, %s2972_s17 }
  0x94   : > { %s3164_s10 = smov [#allocation5]  }
  0x95   : > { %p2975_p7 = pnand %p2973_p2, %p2961_p0  ;;  %s2977_s18 = sshll.u32 %s3164_s10, 4  ;;  %s2978_s18 = int_to_ptr.vmem [resolvable:$false] %s2977_s18 }
  0x96   : > { %s685_s21 = scalar_lea.hbm %s3882_s9, %s2302_s6  ;;  %s2979_s6 = scalar_lea.vmem %s2978_s18, 32 }
  0x97   : > { %p2976_p8 = pneg %p2975_p7  ;;  %p2980_p9 = scmp.lt.s32.totalorder %s688_s13, %s2978_s18 }
  0x98   : > { %p2981_p11 = scmp.lt.s32.totalorder %s2979_s6, %s2972_s17 }
  0x9a   : > { %p2982_p10 = por %p2981_p11, %p2980_p9 }
  0x9c   : > { %p2983_p3 = pnand %p2982_p10, %p2976_p8 }
  0x9e   : > { %2986 = shalt.err (!%p2983_p3)
}
  0x9f   : > { %2601 = dma.hbm_to_vmem [thread:$0]  (!%p3486_p5), %s685_s21, 16, %s688_s13, %s678_s14  }
  0xa0   : > { %p3884_p1 = scmp.ne.s32.totalorder %s3862_s0, 0 }
  0xa1   : > { %s698_s5 = sand.u32 (!%p3884_p1), 1, %s3129_s2  }
  0xa2   : > { %696 = sbr.rel (%p3884_p1) target bundleno = 2804 (0xaf4), region = 96  ;;  %s699_s7 = scalar_lea.sflag (!%p3884_p1), [#allocation6], %s698_s5 }
  0xa3   : > { %s3497_s8 = scalar_lea.vmem (!%p3884_p1), [#allocation5], %s698_s5 }
  0xa7   : > { %3084 = dma.done.wait (%p3449_p4), %s699_s7, 16  }
  0xa8   : > { %3086 = vsyncadd (%p3449_p4), %s699_s7, 4294967280  ;;  %p3885_p6 = scmp.ne.s32.totalorder %s3861_s30, 0 }
  0xaa   : > { %3088 = dma.done.wait (%p3885_p6), [#allocation9], 272  }
  0xab   : > { %3090 = vsyncadd (%p3885_p6), [#allocation9], 4294967024 }
  0xac   : > { %3092 = dma.done.wait (%p3885_p6), [#allocation12], 272  }
  0xad   : > { %3094 = vsyncadd (%p3885_p6), [#allocation12], 4294967024 }
  0xae   : > { %3096 = dma.done.wait (%p3885_p6), [#allocation15], 272  }
  0xaf   : > { %3098 = vsyncadd (%p3885_p6), [#allocation15], 4294967024 }
  0xb0   : > { %3100 = dma.done.wait (%p3885_p6), [#allocation18], 256  }
  0xb1   : > { %3102 = vsyncadd (%p3885_p6), [#allocation18], 4294967040  ;;  %s3520_s13 = sand.u32 1, %s3117_s22   ;;  %p803_p4 = scmp.lt.s32.totalorder %s3141_s26, 1 }
  0xb2   : > { %s2311_s0 = sshll.u32 %s3520_s13, 3  ;;  %s2312_s18 = sshll.u32 %s3520_s13, 5 }
  0xb3   : > { %s804_s10 = scalar_select %p803_p4, %s3141_s26, 1 }
  0xb4   : > { %p805_p5 = scmp.lt.s32.totalorder %s3137_s3, 1  ;;  %s3886_s24 = sld [smem:[#allocation35_spill]] }
  0xb5   : > { %s2313_s20 = sshll.u32 %s804_s10, 1  ;;  %s2379_s12 = sshll.u32 %s804_s10, 3 }
  0xb6   : > { %s806_s9 = scalar_select %p805_p5, %s3137_s3, 1 }
  0xb7   : > { %s3887_s7 = sld [smem:[#allocation34_spill]]  ;;  %s3536_s27 = scalar_lea.vmem [#allocation19], %s2311_s0 }
  0xb8   : > { %s808_s14 = sadd.s32 %s2313_s20, %s806_s9  ;;  %s3538_s11 = scalar_lea.vmem [#allocation20], %s2312_s18 }
  0xb9   : > { %s2314_s17 = sshll.u32 %s808_s14, 3  ;;  %p2317_p0 = scmp.ne.s32.totalorder %s3137_s3, 0 }
  0xba   : > { %s815_s16 = scalar_lea.vmem %s3886_s24, %s2379_s12  ;;  %s3167_s0 = smov (!%p2317_p0), 120  }
  0xbb   : > { %820 = sbr.rel (%p2317_p0) target bundleno = 535 (0x217), region = 132  ;;  %s3168_s18 = smov (!%p2317_p0), 112  }
  0xbc   : > { %s3169_s10 = smov (!%p2317_p0), 104  }
  0xbd   : > { %s3534_s28 = scalar_lea.vmem %s3887_s7, %s2314_s17 }
  0xc0   : > { %v2736_v0 = vld [vmem:[#allocation11 + $0x8] sm:$0xff]   ;;  %v3165_v1 = vmov 0.0   ;;  %v2737_v2 = vld [vmem:[#allocation14 + $0x8] sm:$0xff]   ;;  %vm3166_vm0 = vmmov 0   ;;  %v2739_v4 = vld [vmem:[#allocation14] sm:$0xff]   ;;  %vm851_vm1 = vcmask 261120  }
  0xc1   : > { %2426 = vmatprep.subr.bf16.mxu0 %v3165_v1  ;;  %2434 = vmatprep.subr.bf16.mxu1 %v3165_v1  ;;  %v2738_v3 = vld [vmem:[#allocation11] sm:$0xff]   ;;  %v2318_v6 = vld [vmem:[#allocation13] ss:$0 sm:$0xff]  ;;  %vm968_vm2 = vcmask 60416  }
  0xc2   : > { %2427 = vmatpush3.bf16.msra.mxu0 %v2736_v0  ;;  %2430 = vmatprep.mubr.msk.bf16.mxu0 %vm3166_vm0, %v3165_v1  ;;  %v2740_v5 = vld [vmem:[%s815_s16] sm:$0xff]  }
  0xc3   : > { %2435 = vmatpush3.bf16.msra.mxu1 %v2737_v2  ;;  %2428 = vmatprep.subr.bf16.mxu0 %v3165_v1  ;;  %v2323_v7 = vld [vmem:[#allocation16] ss:$0 sm:$0xff] }
  0xc4   : > { %2436 = vmatprep.subr.bf16.mxu1 %v3165_v1  ;;  %2438 = vmatprep.mubr.msk.bf16.mxu1 %vm3166_vm0, %v3165_v1 }
  0xc6   : > { %2429 = vmatpush3.bf16.msra.mxu0 %v2738_v3 }
  0xc7   : > { %2437 = vmatpush3.bf16.msra.mxu1 %v2739_v4 }
  0xc9   : > { %2431 = vmatmul.mubr.msk.bf16.vlgmr.msra.gmra.mxu0 %vm851_vm1, %v2740_v5 }
  0xca   : > { %2439 = vmatmul.mubr.msk.bf16.vlgmr.msra.gmra.mxu1 %vm851_vm1, %v2740_v5 }
 0x189   : > { %v889_v8 = vpop.f32.mrf.mxu0 }
 0x18a   : > { %v890_v9 = vadd.f32 %v2318_v6, %v889_v8  ;;  %v953_v10 = vpop.f32.mrf.mxu1 }
 0x18b   : > { %v954_v11 = vadd.f32 %v2323_v7, %v953_v10  ;;  %v2432_v12 = vpop.f32.mrf.mxu0 }
 0x18c   : > { %v2380_v13 = vpack.c.bf16 %v890_v9, %v890_v9  ;;  %v2440_v14 = vpop.f32.mrf.mxu1 }
 0x18d   : > { %v2382_v15 = vpack.c.bf16 %v954_v11, %v954_v11  ;;  %v892_v16 = vpop.f32.mrf.mxu0 }
 0x18e   : > { %969 = vst.msk [vmem:[#allocation3] sm:$0xf] %vm968_vm2, %v2380_v13  ;;  %v893_v17 = vadd.f32 %v2318_v6, %v892_v16  ;;  %v956_v18 = vpop.f32.mrf.mxu1  ;;  %981 = vrot.lane.b32.xlu0 %v2380_v13, %s3167_s0 }
 0x18f   : > { %979 = vst.msk [vmem:[#allocation4] sm:$0xf] %vm968_vm2, %v2382_v15  ;;  %v957_v19 = vadd.f32 %v2323_v7, %v956_v18  ;;  %990 = vrot.lane.b32.xlu1 %v2382_v15, %s3167_s0  ;;  %v2433_v20 = vpop.f32.mrf.mxu0 }
 0x190   : > { %v2381_v21 = vpack.c.bf16 %v893_v17, %v893_v17  ;;  %v2441_v22 = vpop.f32.mrf.mxu1 }
 0x191   : > { %v2383_v23 = vpack.c.bf16 %v957_v19, %v957_v19 }
 0x192   : > { %970 = vst.msk [vmem:[#allocation3 + $0x4] sm:$0xf] %vm968_vm2, %v2381_v21  ;;  %999 = vrot.lane.b32.xlu0 %v2380_v13, %s3168_s18 }
 0x193   : > { %980 = vst.msk [vmem:[#allocation4 + $0x4] sm:$0xf] %vm968_vm2, %v2383_v23  ;;  %992 = vrot.lane.b32.xlu1 %v2383_v23, %s3167_s0 }
 0x196   : > { %1008 = vrot.lane.b32.xlu0 %v2382_v15, %s3168_s18 }
 0x197   : > { %1001 = vrot.lane.b32.xlu1 %v2381_v21, %s3168_s18 }
 0x19a   : > { %1017 = vrot.lane.b32.xlu0 %v2380_v13, %s3169_s10 }
 0x19b   : > { %1010 = vrot.lane.b32.xlu1 %v2383_v23, %s3168_s18 }
 0x19e   : > { %983 = vrot.lane.b32.xlu0 %v2381_v21, %s3167_s0 }
 0x19f   : > { %1019 = vrot.lane.b32.xlu1 %v2381_v21, %s3169_s10 }
 0x1a2   : > { %1026 = vrot.lane.b32.xlu0 %v2382_v15, %s3169_s10 }
 0x1a3   : > { %1028 = vrot.lane.b32.xlu1 %v2383_v23, %s3169_s10 }
 0x200   : > { %v982_v24 = vpop.permute.xlu0 %981 }
 0x201   : > { %v991_v25 = vpop.permute.xlu1 %990  ;;  %988 = vst.msk [vmem:[#allocation3 + $0x8] sm:$0xf] %vm968_vm2, %v982_v24 }
 0x202   : > { %997 = vst.msk [vmem:[#allocation4 + $0x8] sm:$0xf] %vm968_vm2, %v991_v25 }
 0x204   : > { %v1000_v26 = vpop.permute.xlu0 %999 }
 0x205   : > { %v993_v27 = vpop.permute.xlu1 %992  ;;  %1006 = vst.msk [vmem:[#allocation3 + $0x10] sm:$0xf] %vm968_vm2, %v1000_v26 }
 0x206   : > { %998 = vst.msk [vmem:[#allocation4 + $0xc] sm:$0xf] %vm968_vm2, %v993_v27 }
 0x208   : > { %v1009_v28 = vpop.permute.xlu0 %1008 }
 0x209   : > { %1015 = vst.msk [vmem:[#allocation4 + $0x10] sm:$0xf] %vm968_vm2, %v1009_v28  ;;  %v1002_v29 = vpop.permute.xlu1 %1001 }
 0x20a   : > { %1007 = vst.msk [vmem:[#allocation3 + $0x14] sm:$0xf] %vm968_vm2, %v1002_v29 }
 0x20c   : > { %v1018_v30 = vpop.permute.xlu0 %1017 }
 0x20d   : > { %1024 = vst.msk [vmem:[#allocation3 + $0x18] sm:$0xf] %vm968_vm2, %v1018_v30  ;;  %v1011_v31 = vpop.permute.xlu1 %1010 }
 0x20e   : > { %1016 = vst.msk [vmem:[#allocation4 + $0x14] sm:$0xf] %vm968_vm2, %v1011_v31 }
 0x210   : > { %v984_v32 = vpop.permute.xlu0 %983 }
 0x211   : > { %v1020_v33 = vpop.permute.xlu1 %1019  ;;  %989 = vst.msk [vmem:[#allocation3 + $0xc] sm:$0xf] %vm968_vm2, %v984_v32 }
 0x212   : > { %1025 = vst.msk [vmem:[#allocation3 + $0x1c] sm:$0xf] %vm968_vm2, %v1020_v33 }
 0x214   : > { %v1027_v34 = vpop.permute.xlu0 %1026 }
 0x215   : > { %v1029_v35 = vpop.permute.xlu1 %1028  ;;  %1033 = vst.msk [vmem:[#allocation4 + $0x18] sm:$0xf] %vm968_vm2, %v1027_v34 }
 0x216   : > { %1034 = vst.msk [vmem:[#allocation4 + $0x1c] sm:$0xf] %vm968_vm2, %v1029_v35 }
 0x217 PF: > { %v2741_v36 = vld [vmem:[#allocation8 + $0x8] sm:$0xff]   ;;  %v3170_v37 = vmov 0.0   ;;  %v2742_v38 = vld [vmem:[#allocation8] sm:$0xff]   ;;  %vm3171_vm3 = vmmov 0   ;;  %vm1060_vm4 = vcmask 261120   ;;  %vm1145_vm5 = vcmask 64512  }
 0x218   : > { %2442 = vmatprep.subr.bf16.mxu1 %v3170_v37  ;;  %2456 = vmatprep.subr.bf16.mxu0 %v3170_v37  ;;  %v3562_v39 = vld [vmem:[%s3534_s28] sm:$0xff]  ;;  %v2743_v41 = vld [vmem:[#allocation3] sm:$0xff]   ;;  %v2744_v43 = vld [vmem:[#allocation3 + $0x8] sm:$0xff]   ;;  %vm1106_vm6 = vcmask 60416   ;;  %s3172_s28 = smov 104   ;;  %s3173_s20 = smov 120   ;;  %v1346_v0 = vlaneseq }
 0x219   : > { %2443 = vmatpush3.bf16.msra.mxu1 %v2741_v36  ;;  %2446 = vmatprep.mubr.msk.bf16.mxu1 %vm3171_vm3, %v3170_v37  ;;  %v1036_v40 = vpack.c.bf16 %v3562_v39, %v3562_v39  ;;  %v1150_v42 = vsel %vm1145_vm5, %v2743_v41, 0  ;;  %v1201_v44 = vsel %vm1145_vm5, %v2744_v43, 0  ;;  %v2331_v45 = vld [vmem:[#allocation10] ss:$0 sm:$0xff]  ;;  %s3174_s12 = smov 112   ;;  %v2746_v58 = vld [vmem:[#allocation3 + $0x18] sm:$0xff]  }
 0x21a   : > { %2444 = vmatprep.subr.bf16.mxu1 %v3170_v37  ;;  %2458 = vmatprep.mubr.msk.bf16.mxu0 %vm3171_vm3, %v3170_v37  ;;  %v2745_v53 = vld [vmem:[#allocation3 + $0x10] sm:$0xff]   ;;  %v1303_v60 = vsel %vm1145_vm5, %v2746_v58, 0  ;;  %v1347_v2 = vshrl.u32 %v1346_v0, 7  ;;  %v3175_v4 = vmov 0   ;;  %vm1355_vm9 = vcmask 130048   ;;  %v2747_v36 = vld [vmem:[#allocation4] sm:$0xff]  }
 0x21b   : > { %2457 = vmatpush3.bf16.xpose.msra.mxu0 %v1201_v44  ;;  %v1252_v54 = vsel %vm1145_vm5, %v2745_v53, 0  ;;  %v1126_v1 = vld [vmem:[%s3497_s8] sm:$0x1]  ;;  %s3888_s21 = sld [smem:[#allocation43_spill]]  ;;  %vm1631_vm10 = vcmask 1043456   ;;  %vm1967_vm11 = vcmask 523264  }
 0x21c   : > { %2468 = vmatprep.subr.bf16.mxu0 %v3170_v37  ;;  %vm1127_vm7 = vcmp.ne.f32.partialorder %v1126_v1, 0.0  ;;  %v1348_v3 = vsub.s32 0, %v1347_v2  ;;  %v2749_v58 = vld [vmem:[#allocation4 + $0x10] sm:$0xff]   ;;  %s3889_s0 = sld [smem:[#allocation44_spill]]  ;;  %s2375_s30 = sshll.u32 %s3141_s26, 3 }
 0x21d   : > { %2445 = vmatpush3.bf16.msra.mxu1 %v2742_v38  ;;  %v1345_v5 = vsel %vm1127_vm7, 1, %v3175_v4  ;;  %v2750_v1 = vld [vmem:[#allocation4 + $0x18] sm:$0xff]   ;;  %s3892_s24 = sld [smem:[#allocation45_spill]]  ;;  %s2077_s14 = sshll.u32 %s3538_s11, 4  ;;  %s3715_s14 = int_to_ptr.vmem [resolvable:$true] %s2077_s14 }
 0x21e   : > { %2450 = vmatprep.subr.bf16.mxu1 %v3170_v37  ;;  %v1349_v6 = vrot.slane %v1345_v5, %v1348_v3  ;;  %s3893_s17 = sld [smem:[#allocation46_spill]]  ;;  %s2987_s18 = scalar_lea.vmem %s3715_s14, 512 }
 0x21f   : > { %s3895_s9 = sld [smem:[#allocation50_spill]]  ;;  %p2988_p2 = scmp.ne.s32.totalorder %s3715_s14, %s2987_s18 }
 0x220   : > { %2447 = vmatmul.mubr.msk.bf16.vlgmr.msra.gmra.mxu1 %vm1060_vm4, %v1036_v40  ;;  %vm1350_vm8 = vcmp.eq.s32.totalorder %v1349_v6, 1  ;;  %s3896_s5 = sld [smem:[#allocation54_spill]]  ;;  %s3176_s10 = smov [#allocation20]  }
 0x221   : > { %2452 = vmatprep.mubr.msk.bf16.mxu1 %vm3171_vm3, %v3170_v37  ;;  %2451 = vmatpush3.bf16.xpose.msra.mxu1 %v1150_v42  ;;  %v1624_v4 = vld [vmem:[%s3888_s21] sm:$0xf]  ;;  %p2989_p7 = pnand %p2988_p2, %p3464_p12 }
 0x222   : > { %2462 = vmatprep.subr.bf16.mxu1 %v3170_v37 }
 0x223   : > { %p2990_p8 = pneg %p2989_p7 }
 0x2e0   : > { %v1098_v46 = vpop.f32.mrf.mxu1 }
 0x2e1   : > { %v1099_v47 = vadd.f32 %v2331_v45, %v1098_v46 }
 0x2e2   : > { %v2448_v48 = vpop.f32.mrf.mxu1 }
 0x2e3   : > { %v1104_v49 = vmul.f32 0.35355338, %v1099_v47 }
 0x2e4   : > { %v1101_v50 = vpop.f32.mrf.mxu1 }
 0x2e5   : > { %v1105_v51 = vpack.c.bf16 %v1104_v49, %v1104_v49 }
 0x2e6   : > { %v2449_v52 = vpop.f32.mrf.mxu1 }
 0x2e7   : > { %1107 = vst.msk [vmem:[#allocation2] sm:$0xf] %vm1106_vm6, %v1105_v51  ;;  %1121 = vrot.lane.b32.xlu1 %v1105_v51, %s3172_s28  ;;  %1111 = vrot.lane.b32.xlu0 %v1105_v51, %s3173_s20  ;;  %s3890_s28 = sld [smem:[#allocation49_spill]] }
 0x2eb   : > { %1116 = vrot.lane.b32.xlu0 %v1105_v51, %s3174_s12 }
 0x2ed   : > { %s3891_s20 = smov %s3890_s28 }
 0x2ee   : > { %v1128_v55 = vld [vmem:[#allocation2] sm:$0xf] }
 0x2ef   : > { %2453 = vmatmul.mubr.msk.bf16.vlgmr.msra.gmra.mxu1 %vm1145_vm5, %v1128_v55 }
 0x2f0   : > { %2463 = vmatpush3.bf16.xpose.msra.mxu1 %v1252_v54  ;;  %2464 = vmatprep.mubr.msk.bf16.mxu1 %vm3171_vm3, %v3170_v37  ;;  %v2748_v54 = vld [vmem:[#allocation4 + $0x8] sm:$0xff]  }
 0x2f1   : > { %2474 = vmatprep.subr.bf16.mxu1 %v3170_v37 }
 0x359   : > { %v1122_v56 = vpop.permute.xlu1 %1121  ;;  %v1112_v57 = vpop.permute.xlu0 %1111 }
 0x35a   : > { %1125 = vst.msk [vmem:[#allocation2 + $0xc] sm:$0xf] %vm1106_vm6, %v1122_v56  ;;  %1115 = vst.msk [vmem:[#allocation2 + $0x4] sm:$0xf] %vm1106_vm6, %v1112_v57 }
 0x35d   : > { %v1117_v59 = vpop.permute.xlu0 %1116 }
 0x35e   : > { %1120 = vst.msk [vmem:[#allocation2 + $0x8] sm:$0xf] %vm1106_vm6, %v1117_v59 }
 0x361   : > { %v1129_v61 = vld [vmem:[#allocation2 + $0x4] sm:$0xf]  ;;  %v1131_v63 = vld [vmem:[#allocation2 + $0xc] sm:$0xf] }
 0x362   : > { %2459 = vmatmul.mubr.msk.bf16.vlgmr.msra.gmra.mxu0 %vm1145_vm5, %v1129_v61 }
 0x363   : > { %2469 = vmatpush3.bf16.xpose.msra.mxu0 %v1303_v60  ;;  %2470 = vmatprep.mubr.msk.bf16.mxu0 %vm3171_vm3, %v3170_v37 }
 0x364   : > { %2480 = vmatprep.subr.bf16.mxu0 %v3170_v37 }
 0x365   : > { %v1130_v62 = vld [vmem:[#allocation2 + $0x8] sm:$0xf] }
 0x366   : > { %2465 = vmatmul.mubr.msk.bf16.vlgmr.msra.gmra.mxu1 %vm1145_vm5, %v1130_v62 }
 0x367   : > { %2476 = vmatprep.mubr.msk.bf16.mxu1 %vm3171_vm3, %v3170_v37  ;;  %2475 = vmatpush3.bf16.msra.mxu1 %v2747_v36 }
 0x368   : > { %2486 = vmatprep.subr.bf16.mxu1 %v3170_v37 }
 0x36a   : > { %2471 = vmatmul.mubr.msk.bf16.vlgmr.msra.gmra.mxu0 %vm1145_vm5, %v1131_v63 }
 0x36b   : > { %2482 = vmatprep.mubr.msk.bf16.mxu0 %vm3171_vm3, %v3170_v37  ;;  %2481 = vmatpush3.bf16.msra.mxu0 %v2748_v54 }
 0x36c   : > { %2492 = vmatprep.subr.bf16.mxu0 %v3170_v37 }
 0x3af   : > { %v1186_v7 = vpop.f32.mrf.mxu1 }
 0x3b0   : > { %v1351_v8 = vsel %vm1350_vm8, %v1186_v7, -1e+09  ;;  %v1633_v7 = vsel %vm1631_vm10, %v1624_v4, 0 }
 0x3b1   : > { %v2454_v9 = vpop.f32.mrf.mxu1  ;;  %v1356_v10 = vsel %vm1355_vm9, %v1351_v8, -inf }
 0x3b2   : > { %1357 = vmax.xlane.f32.xlu1 %v1356_v10  ;;  %v1625_v9 = vld [vmem:[%s3888_s21 + $0x4] sm:$0xf] }
 0x3b3   : > { %v1189_v11 = vpop.f32.mrf.mxu1 }
 0x3b5   : > { %v2455_v12 = vpop.f32.mrf.mxu1 }
 0x3b6   : > { %v1679_v12 = vsel %vm1631_vm10, %v1625_v9, 0  ;;  %v2754_v9 = vld [vmem:[%s3891_s20 + $0x10] sm:$0xff]  }
 0x422   : > { %v1237_v13 = vpop.f32.mrf.mxu0 }
 0x423   : > { %v1352_v14 = vsel %vm1350_vm8, %v1237_v13, -1e+09  ;;  %v1626_v13 = vld [vmem:[%s3888_s21 + $0x8] sm:$0xf] }
 0x424   : > { %v2460_v15 = vpop.f32.mrf.mxu0  ;;  %v1359_v16 = vsel %vm1355_vm9, %v1352_v14, -inf }
 0x425   : > { %1360 = vmax.xlane.f32.xlu0 %v1359_v16  ;;  %v1725_v16 = vsel %vm1631_vm10, %v1626_v13, 0 }
 0x426   : > { %v1240_v17 = vpop.f32.mrf.mxu0  ;;  %v1288_v18 = vpop.f32.mrf.mxu1 }
 0x427   : > { %v1353_v19 = vsel %vm1350_vm8, %v1288_v18, -1e+09 }
 0x428   : > { %v2461_v20 = vpop.f32.mrf.mxu0  ;;  %v2466_v21 = vpop.f32.mrf.mxu1  ;;  %v1362_v22 = vsel %vm1355_vm9, %v1353_v19, -inf }
 0x429   : > { %1363 = vmax.xlane.f32.xlu0 %v1362_v22  ;;  %v1627_v20 = vld [vmem:[%s3888_s21 + $0xc] sm:$0xf] }
 0x42a   : > { %v1291_v23 = vpop.f32.mrf.mxu1  ;;  %v1339_v24 = vpop.f32.mrf.mxu0 }
 0x42b   : > { %v1354_v25 = vsel %vm1350_vm8, %v1339_v24, -1e+09  ;;  %v1771_v23 = vsel %vm1631_vm10, %v1627_v20, 0  ;;  %v2755_v20 = vld [vmem:[%s3891_s20 + $0x8] sm:$0xff]  }
 0x42c   : > { %v2467_v26 = vpop.f32.mrf.mxu1  ;;  %v2472_v27 = vpop.f32.mrf.mxu0  ;;  %v1365_v28 = vsel %vm1355_vm9, %v1354_v25, -inf }
 0x42d   : > { %1366 = vmax.xlane.f32.xlu1 %v1365_v28 }
 0x42e   : > { %v1342_v29 = vpop.f32.mrf.mxu0 }
 0x430   : > { %v2473_v30 = vpop.f32.mrf.mxu0 }
 0x43b   : > { %v1358_v31 = vpop.xlane.xlu1 %1357 }
 0x43c   : > { %v1368_v32 = vsub.f32 %v1351_v8, %v1358_v31 }
 0x43e   : > { %v1372_v33 = vmul.f32 1.442695, %v1368_v32 }
 0x440   : > { %2757 = vpow2.f32 %v1372_v33 }
 0x44d   : > { %v2758_v34 = vpop.eup %2757 }
 0x44e   : > { %v1380_v35 = vsel %vm1355_vm9, %v2758_v34, 0.0 }
 0x44f   : > { %1381 = vadd.xlane.f32.xlu0 %v1380_v35 }
 0x4ae   : > { %v1361_v38 = vpop.xlane.xlu0 %1360 }
 0x4af   : > { %v1369_v40 = vsub.f32 %v1352_v14, %v1361_v38 }
 0x4b1   : > { %v1374_v41 = vmul.f32 1.442695, %v1369_v40 }
 0x4b2   : > { %v1364_v42 = vpop.xlane.xlu0 %1363 }
 0x4b3   : > { %2759 = vpow2.f32 %v1374_v41  ;;  %v1370_v43 = vsub.f32 %v1353_v19, %v1364_v42 }
 0x4b5   : > { %v1376_v44 = vmul.f32 1.442695, %v1370_v43 }
 0x4b6   : > { %v1367_v45 = vpop.xlane.xlu1 %1366 }
 0x4b7   : > { %2761 = vpow2.f32 %v1376_v44  ;;  %v1371_v46 = vsub.f32 %v1354_v25, %v1367_v45 }
 0x4b9   : > { %v1378_v47 = vmul.f32 1.442695, %v1371_v46 }
 0x4bb   : > { %2763 = vpow2.f32 %v1378_v47 }
 0x4c0   : > { %v2760_v48 = vpop.eup %2759 }
 0x4c1   : > { %v1383_v49 = vsel %vm1355_vm9, %v2760_v48, 0.0 }
 0x4c2   : > { %1384 = vadd.xlane.f32.xlu1 %v1383_v49 }
 0x4c4   : > { %v2762_v50 = vpop.eup %2761 }
 0x4c5   : > { %v1386_v51 = vsel %vm1355_vm9, %v2762_v50, 0.0 }
 0x4c6   : > { %1387 = vadd.xlane.f32.xlu0 %v1386_v51 }
 0x4c8   : > { %v2764_v52 = vpop.eup %2763 }
 0x4c9   : > { %v1389_v53 = vsel %vm1355_vm9, %v2764_v52, 0.0 }
 0x4ca   : > { %1390 = vadd.xlane.f32.xlu1 %v1389_v53 }
 0x4d8   : > { %v1382_v55 = vpop.xlane.xlu0 %1381 }
 0x4d9   : > { %2765 = vrcp.f32 %v1382_v55 }
 0x4e6   : > { %v2766_v56 = vpop.eup %2765 }
 0x4e7   : > { %v1396_v57 = vmul.f32 %v2766_v56, %v2758_v34 }
 0x4e9   : > { %1408 = vst.msk [vmem:[%s3538_s11] sm:$0xff] %vm1355_vm9, %v1396_v57  ;;  %v1412_v59 = vpack.c.bf16 %v1396_v57, %v1396_v57  ;;  %v2356_v57 = vld [vmem:[%s3889_s0] ss:$0 sm:$0xff]  ;;  %s2048_s0 = scalar_lea.sflag [#allocation21], %s3520_s13 }
 0x4eb   : > { %2477 = vmatmul.mubr.msk.bf16.vlgmr.msra.gmra.mxu1 %vm1355_vm9, %v1412_v59 }
 0x4ec   : > { %2487 = vmatpush3.bf16.msra.mxu1 %v2749_v58  ;;  %2488 = vmatprep.mubr.msk.bf16.mxu1 %vm3171_vm3, %v3170_v37 }
 0x4ed   : > { %2498 = vmatprep.subr.bf16.mxu1 %v3170_v37 }
 0x54b   : > { %v1385_v60 = vpop.xlane.xlu1 %1384 }
 0x54c   : > { %2767 = vrcp.f32 %v1385_v60 }
 0x54f   : > { %v1388_v61 = vpop.xlane.xlu0 %1387 }
 0x550   : > { %2769 = vrcp.f32 %v1388_v61 }
 0x553   : > { %v1391_v62 = vpop.xlane.xlu1 %1390 }
 0x554   : > { %2771 = vrcp.f32 %v1391_v62 }
 0x559   : > { %v2768_v63 = vpop.eup %2767 }
 0x55a   : > { %v1397_v0 = vmul.f32 %v2768_v63, %v2760_v48 }
 0x55c   : > { %1409 = vst.msk [vmem:[%s3538_s11 + $0x8] sm:$0xff] %vm1355_vm9, %v1397_v0  ;;  %v1413_v2 = vpack.c.bf16 %v1397_v0, %v1397_v0 }
 0x55d   : > { %v2770_v3 = vpop.eup %2769 }
 0x55e   : > { %2483 = vmatmul.mubr.msk.bf16.vlgmr.msra.gmra.mxu0 %vm1355_vm9, %v1413_v2  ;;  %v1398_v5 = vmul.f32 %v2770_v3, %v2762_v50 }
 0x55f   : > { %2493 = vmatpush3.bf16.msra.mxu0 %v2750_v1  ;;  %2494 = vmatprep.mubr.msk.bf16.mxu0 %vm3171_vm3, %v3170_v37 }
 0x560   : > { %1410 = vst.msk [vmem:[%s3538_s11 + $0x10] sm:$0xff] %vm1355_vm9, %v1398_v5  ;;  %v1414_v6 = vpack.c.bf16 %v1398_v5, %v1398_v5  ;;  %2504 = vmatprep.subr.bf16.mxu0 %v3170_v37 }
 0x561   : > { %v2772_v8 = vpop.eup %2771 }
 0x562   : > { %2489 = vmatmul.mubr.msk.bf16.vlgmr.msra.gmra.mxu1 %vm1355_vm9, %v1414_v6  ;;  %v1399_v10 = vmul.f32 %v2772_v8, %v2764_v52  ;;  %v2752_v8 = vld [vmem:[#allocation17] sm:$0xff]  }
 0x563   : > { %2499 = vmatpush3.bf16.msra.mxu1 %v1633_v7  ;;  %2500 = vmatprep.mubr.msk.bf16.mxu1 %vm3171_vm3, %v3170_v37  ;;  %v2751_v7 = vld [vmem:[#allocation17 + $0x8] sm:$0xff]  }
 0x564   : > { %1411 = vst.msk [vmem:[%s3538_s11 + $0x18] sm:$0xff] %vm1355_vm9, %v1399_v10  ;;  %v1415_v11 = vpack.c.bf16 %v1399_v10, %v1399_v10  ;;  %2510 = vmatprep.subr.bf16.mxu1 %v3170_v37 }
 0x566   : > { %2495 = vmatmul.mubr.msk.bf16.vlgmr.msra.gmra.mxu0 %vm1355_vm9, %v1415_v11 }
 0x567   : > { %2505 = vmatpush3.bf16.msra.mxu0 %v1679_v12  ;;  %2506 = vmatprep.mubr.msk.bf16.mxu0 %vm3171_vm3, %v3170_v37 }
 0x568   : > { %2516 = vmatprep.subr.bf16.mxu0 %v3170_v37 }
 0x5ab   : > { %v1467_v14 = vpop.f32.mrf.mxu1 }
 0x5ac   : > { %v1620_v15 = vpack.c.bf16 %v1467_v14, %v1467_v14  ;;  %v2357_v14 = vld [vmem:[%s3892_s24] ss:$0 sm:$0xff]  ;;  %s2074_s24 = sadd.s32 %s3137_s3, %s2375_s30 }
 0x5ad   : > { %v2478_v17 = vpop.f32.mrf.mxu1  ;;  %s2376_s16 = sshll.u32 %s2074_s24, 7 }
 0x5ae   : > { %2501 = vmatmul.mubr.msk.bf16.vlgmr.msra.gmra.mxu1 %vm1145_vm5, %v1620_v15  ;;  %s3713_s7 = scalar_lea.hbm %s3896_s5, %s2376_s16 }
 0x5af   : > { %v1470_v18 = vpop.f32.mrf.mxu1  ;;  %2511 = vmatpush3.bf16.msra.mxu1 %v1725_v16  ;;  %2512 = vmatprep.mubr.msk.bf16.mxu1 %vm3171_vm3, %v3170_v37  ;;  %v2358_v16 = vld [vmem:[%s3893_s17] ss:$0 sm:$0xff] }
 0x5b0   : > { %2522 = vmatprep.subr.bf16.mxu1 %v3170_v37 }
 0x5b1   : > { %v2479_v19 = vpop.f32.mrf.mxu1 }
 0x61e   : > { %v1516_v21 = vpop.f32.mrf.mxu0 }
 0x61f   : > { %v1621_v22 = vpack.c.bf16 %v1516_v21, %v1516_v21  ;;  %v2756_v21 = vld [vmem:[%s3891_s20] sm:$0xff]  }
 0x620   : > { %v2484_v24 = vpop.f32.mrf.mxu0 }
 0x621   : > { %2507 = vmatmul.mubr.msk.bf16.vlgmr.msra.gmra.mxu0 %vm1145_vm5, %v1621_v22 }
 0x622   : > { %2517 = vmatpush3.bf16.msra.mxu0 %v1771_v23  ;;  %v1519_v25 = vpop.f32.mrf.mxu0  ;;  %v1565_v26 = vpop.f32.mrf.mxu1  ;;  %2518 = vmatprep.mubr.msk.bf16.mxu0 %vm3171_vm3, %v3170_v37 }
 0x623   : > { %v1622_v27 = vpack.c.bf16 %v1565_v26, %v1565_v26  ;;  %2530 = vmatprep.subr.bf16.mxu0 %v3170_v37 }
 0x624   : > { %v2485_v28 = vpop.f32.mrf.mxu0  ;;  %v2490_v29 = vpop.f32.mrf.mxu1 }
 0x625   : > { %2513 = vmatmul.mubr.msk.bf16.vlgmr.msra.gmra.mxu1 %vm1145_vm5, %v1622_v27 }
 0x626   : > { %v1568_v30 = vpop.f32.mrf.mxu1  ;;  %v1614_v31 = vpop.f32.mrf.mxu0  ;;  %2526 = vmatprep.mubr.msk.bf16.mxu1 %vm3171_vm3, %v3170_v37  ;;  %2523 = vmatpush3.bf16.msra.mxu1 %v2751_v7 }
 0x627   : > { %v1623_v32 = vpack.c.bf16 %v1614_v31, %v1614_v31  ;;  %2524 = vmatprep.subr.bf16.mxu1 %v3170_v37 }
 0x628   : > { %v2491_v33 = vpop.f32.mrf.mxu1  ;;  %v2496_v34 = vpop.f32.mrf.mxu0 }
 0x629   : > { %2519 = vmatmul.mubr.msk.bf16.vlgmr.msra.gmra.mxu0 %vm1145_vm5, %v1623_v32 }
 0x62a   : > { %v1617_v35 = vpop.f32.mrf.mxu0  ;;  %2538 = vmatprep.mubr.msk.bf16.mxu0 %vm3171_vm3, %v3170_v37  ;;  %2525 = vmatpush3.bf16.msra.mxu1 %v2752_v8 }
 0x62c   : > { %v2497_v36 = vpop.f32.mrf.mxu0 }
 0x66e   : > { %v1669_v38 = vpop.f32.mrf.mxu1 }
 0x66f   : > { %v1813_v48 = vsel %vm1060_vm4, %v1669_v38, 0.0 }
 0x670   : > { %v2502_v40 = vpop.f32.mrf.mxu1 }
 0x672   : > { %v1672_v41 = vpop.f32.mrf.mxu1 }
 0x674   : > { %v2503_v42 = vpop.f32.mrf.mxu1 }
 0x6e1   : > { %v1715_v43 = vpop.f32.mrf.mxu0 }
 0x6e2   : > { %v1814_v45 = vsel %vm1060_vm4, %v1715_v43, 0.0 }
 0x6e3   : > { %v2508_v44 = vpop.f32.mrf.mxu0  ;;  %v1815_v50 = vadd.f32 %v1814_v45, %v1813_v48 }
 0x6e5   : > { %v1718_v46 = vpop.f32.mrf.mxu0  ;;  %v1761_v47 = vpop.f32.mrf.mxu1 }
 0x6e6   : > { %v1816_v49 = vsel %vm1060_vm4, %v1761_v47, 0.0 }
 0x6e7   : > { %v2509_v51 = vpop.f32.mrf.mxu0  ;;  %v2514_v52 = vpop.f32.mrf.mxu1  ;;  %v1817_v53 = vadd.f32 %v1816_v49, %v1815_v50 }
 0x6e9   : > { %v1764_v54 = vpop.f32.mrf.mxu1  ;;  %v1807_v55 = vpop.f32.mrf.mxu0 }
 0x6ea   : > { %v1818_v56 = vsel %vm1060_vm4, %v1807_v55, 0.0 }
 0x6eb   : > { %v1819_v58 = vadd.f32 %v1818_v56, %v1817_v53  ;;  %v2515_v59 = vpop.f32.mrf.mxu1  ;;  %v2520_v60 = vpop.f32.mrf.mxu0 }
 0x6ed   : > { %v1827_v61 = vadd.f32 %v2356_v57, %v1819_v58  ;;  %v1810_v62 = vpop.f32.mrf.mxu0 }
 0x6ef   : > { %v2521_v63 = vpop.f32.mrf.mxu0  ;;  %v1828_v0 = vadd.f32 %v1827_v61, %v3562_v39  ;;  %v2753_v39 = vld [vmem:[%s3890_s28 + $0x18] sm:$0xff]   ;;  %s3894_s28 = sld [smem:[#allocation48_spill]] }
 0x6f0   : > { %2531 = vmatpush3.bf16.msra.mxu0 %v2753_v39 }
 0x6f1   : > { %v1829_v1 = vsel %vm1060_vm4, %v1828_v0, 0.0  ;;  %2532 = vmatprep.subr.bf16.mxu0 %v3170_v37 }
 0x6f2   : > { %1830 = vadd.xlane.f32.xlu0 %v1829_v1 }
 0x6f4   : > { %2533 = vmatpush3.bf16.msra.mxu0 %v2754_v9 }
 0x6f5   : > { %2534 = vmatprep.subr.bf16.mxu0 %v3170_v37  ;;  %v2359_v22 = vld [vmem:[%s3894_s28] ss:$0 sm:$0xff]  ;;  %s2991_s28 = sshll.u32 %s3176_s10, 4  ;;  %s2992_s28 = int_to_ptr.vmem [resolvable:$false] %s2991_s28 }
 0x6f6   : > { %s2993_s11 = scalar_lea.vmem %s2992_s28, 1024  ;;  %p2994_p9 = scmp.lt.s32.totalorder %s3715_s14, %s2992_s28 }
 0x6f7   : > { %p2995_p11 = scmp.lt.s32.totalorder %s2993_s11, %s2987_s18 }
 0x6f8   : > { %2535 = vmatpush3.bf16.msra.mxu0 %v2755_v20 }
 0x6f9   : > { %2536 = vmatprep.subr.bf16.mxu0 %v3170_v37  ;;  %v2363_v37 = vld [vmem:[%s3895_s9] ss:$0 sm:$0xff]  ;;  %p2996_p10 = por %p2995_p11, %p2994_p9 }
 0x6fb   : > { %p2997_p3 = pnand %p2996_p10, %p2990_p8 }
 0x6fc   : > { %2537 = vmatpush3.bf16.msra.mxu0 %v2756_v21 }
 0x77b   : > { %v1831_v2 = vpop.xlane.xlu0 %1830 }
 0x77c   : > { %v1833_v3 = vmul.f32 0.03125, %v1831_v2 }
 0x77e   : > { %v1834_v4 = vsub.f32 %v1828_v0, %v1833_v3 }
 0x780   : > { %v1835_v5 = vmul.f32 %v1834_v4, %v1834_v4 }
 0x782   : > { %v1836_v6 = vsel %vm1060_vm4, %v1835_v5, 0.0 }
 0x783   : > { %1837 = vadd.xlane.f32.xlu1 %v1836_v6 }
 0x80c   : > { %v1838_v10 = vpop.xlane.xlu1 %1837 }
 0x80d   : > { %v1839_v11 = vmul.f32 0.03125, %v1838_v10 }
 0x80f   : > { %v1840_v12 = vadd.f32 1e-05, %v1839_v11 }
 0x811   : > { %2773 = vrsqrt.f32 %v1840_v12 }
 0x81e   : > { %v2774_v13 = vpop.eup %2773 }
 0x81f   : > { %v1842_v15 = vmul.f32 %v2774_v13, %v1834_v4 }
 0x821   : > { %v1850_v17 = vmul.f32 %v2357_v14, %v1842_v15 }
 0x823   : > { %v1858_v18 = vadd.f32 %v2358_v16, %v1850_v17 }
 0x825   : > { %v1859_v19 = vpack.c.bf16 %v1858_v18, %v1858_v18 }
 0x827   : > { %2527 = vmatmul.mubr.msk.bf16.vlgmr.msra.gmra.mxu1 %vm1060_vm4, %v1859_v19 }
 0x8e7   : > { %v1920_v23 = vpop.f32.mrf.mxu1 }
 0x8e8   : > { %v1921_v24 = vadd.f32 %v2359_v22, %v1920_v23 }
 0x8e9   : > { %v2528_v25 = vpop.f32.mrf.mxu1 }
 0x8ea   : > { %v1926_v26 = vmax.f32 %v1921_v24, 0.0 }
 0x8eb   : > { %v1923_v27 = vpop.f32.mrf.mxu1 }
 0x8ec   : > { %v1927_v28 = vpack.c.bf16 %v1926_v26, %v1926_v26 }
 0x8ed   : > { %v2529_v29 = vpop.f32.mrf.mxu1 }
 0x8ee   : > { %2539 = vmatmul.mubr.msk.bf16.vlgmr.msra.gmra.mxu0 %vm1967_vm11, %v1927_v28 }
 0x9ae   : > { %v2005_v30 = vpop.f32.mrf.mxu0 }
 0x9af   : > { %v2006_v31 = vadd.f32 %v2363_v37, %v2005_v30 }
 0x9b0   : > { %v2540_v32 = vpop.f32.mrf.mxu0 }
 0x9b1   : > { %v2011_v33 = vadd.f32 %v2006_v31, %v1858_v18 }
 0x9b2   : > { %v2008_v34 = vpop.f32.mrf.mxu0 }
 0x9b3   : > { %v2012_v35 = vsel %vm1060_vm4, %v2011_v33, 0.0 }
 0x9b4   : > { %2013 = vadd.xlane.f32.xlu0 %v2012_v35  ;;  %v2541_v36 = vpop.f32.mrf.mxu0 }
 0xa3d   : > { %v2014_v38 = vpop.xlane.xlu0 %2013 }
 0xa3e   : > { %v2015_v40 = vmul.f32 0.03125, %v2014_v38 }
 0xa40   : > { %v2016_v41 = vsub.f32 %v2011_v33, %v2015_v40 }
 0xa42   : > { %v2017_v42 = vmul.f32 %v2016_v41, %v2016_v41 }
 0xa44   : > { %v2018_v43 = vsel %vm1060_vm4, %v2017_v42, 0.0 }
 0xa45   : > { %2019 = vadd.xlane.f32.xlu1 %v2018_v43 }
 0xa46   : > { %3000 = shalt.err (!%p2997_p3)
}
 0xa47   : > { %s3001_s12 = scalar_lea.hbm %s3713_s7, 512  ;;  %s3005_s30 = scalar_lea.hbm %s3896_s5, 2048 }
 0xa48   : > { %p3002_p1 = scmp.ne.s32.totalorder %s3713_s7, %s3001_s12  ;;  %p3006_p5 = scmp.lt.s32.totalorder %s3713_s7, %s3896_s5 }
 0xa49   : > { %p3007_p0 = scmp.lt.s32.totalorder %s3005_s30, %s3001_s12 }
 0xa4a   : > { %p3003_p6 = pnand %p3002_p1, %p3464_p12 }
 0xa4b   : > { %p3008_p2 = por %p3007_p0, %p3006_p5 }
 0xa4c   : > { %p3004_p4 = pneg %p3003_p6 }
 0xa4e   : > { %p3009_p7 = pnand %p3008_p2, %p3004_p4 }
 0xa50   : > { %3012 = shalt.err (!%p3009_p7)
}
 0xa51   : > { %s3177_s17 = smov 128   ;;  %s3178_s6 = smov 256  }
 0xa52   : > { %s3179_s18 = smov 8   ;;  %s2373_s10 = sshll.u32 %s3141_s26, 1 }
 0xa53   : > { %2573 = dma.vmem_to_hbm [thread:$0]  (%p3464_p12), %s3715_s14, 512, %s3713_s7, %s2048_s0, %s3177_s17, %s3178_s6, %s3179_s18  }
 0xa54   : > { %s2059_s28 = sadd.s32 %s3137_s3, %s2373_s10  ;;  %s3897_s8 = sld [smem:[#allocation51_spill]] }
 0xa55   : > { %s3898_s24 = sld [smem:[#allocation52_spill]]  ;;  %s2374_s14 = sshll.u32 %s2059_s28, 7 }
 0xa56   : > { %s2063_s7 = sshll.u32 %s3536_s27, 4  ;;  %s3899_s17 = sld [smem:[#allocation53_spill]]  ;;  %s2064_s7 = int_to_ptr.vmem [resolvable:$true] %s2063_s7 }
 0xa57   : > { %s2043_s3 = scalar_lea.sflag [#allocation7], %s3520_s13  ;;  %s3013_s6 = scalar_lea.vmem %s2064_s7, 128 }
 0xa58   : > { %p3014_p8 = scmp.ne.s32.totalorder %s2064_s7, %s3013_s6  ;;  %s3180_s18 = smov [#allocation19]  }
 0xa59   : > { %s3017_s10 = sshll.u32 %s3180_s18, 4  ;;  %s3018_s10 = int_to_ptr.vmem [resolvable:$false] %s3017_s10 }
 0xa5a   : > { %v2369_v48 = vld [vmem:[%s3897_s8] ss:$0 sm:$0xff]  ;;  %p3015_p9 = pnand %p3014_p8, %p3464_p12  ;;  %s3019_s28 = scalar_lea.vmem %s3018_s10, 256 }
 0xa5b   : > { %v2370_v50 = vld [vmem:[%s3898_s24] ss:$0 sm:$0xff]  ;;  %p3020_p10 = scmp.lt.s32.totalorder %s2064_s7, %s3018_s10  ;;  %p3021_p3 = scmp.lt.s32.totalorder %s3019_s28, %s3013_s6 }
 0xa5c   : > { %s2061_s26 = scalar_lea.hbm %s3899_s17, %s2374_s14  ;;  %p3016_p11 = pneg %p3015_p9 }
 0xa5d   : > { %p3022_p1 = por %p3021_p3, %p3020_p10 }
 0xa5f   : > { %p3023_p6 = pnand %p3022_p1, %p3016_p11 }
 0xace   : > { %v2020_v44 = vpop.xlane.xlu1 %2019 }
 0xacf   : > { %v2021_v45 = vmul.f32 0.03125, %v2020_v44 }
 0xad1   : > { %v2022_v46 = vadd.f32 1e-05, %v2021_v45 }
 0xad3   : > { %2775 = vrsqrt.f32 %v2022_v46 }
 0xae0   : > { %v2776_v47 = vpop.eup %2775 }
 0xae1   : > { %v2024_v49 = vmul.f32 %v2776_v47, %v2016_v41 }
 0xae3   : > { %v2032_v51 = vmul.f32 %v2369_v48, %v2024_v49 }
 0xae5   : > { %v2040_v52 = vadd.f32 %v2370_v50, %v2032_v51 }
 0xae7   : > { %2041 = vst.msk [vmem:[%s3536_s27] sm:$0xff] %vm1060_vm4, %v2040_v52 }
 0xae8   : > { %3026 = shalt.err (!%p3023_p6)
}
 0xae9   : > { %s3027_s11 = scalar_lea.hbm %s2061_s26, 128  ;;  %s3031_s12 = scalar_lea.hbm %s3899_s17, 512 }
 0xaea   : > { %p3028_p4 = scmp.ne.s32.totalorder %s2061_s26, %s3027_s11  ;;  %p3032_p2 = scmp.lt.s32.totalorder %s2061_s26, %s3899_s17 }
 0xaeb   : > { %p3033_p7 = scmp.lt.s32.totalorder %s3031_s12, %s3027_s11 }
 0xaec   : > { %p3029_p5 = pnand %p3028_p4, %p3464_p12 }
 0xaed   : > { %p3034_p8 = por %p3033_p7, %p3032_p2 }
 0xaee   : > { %p3030_p0 = pneg %p3029_p5 }
 0xaf0   : > { %p3035_p9 = pnand %p3034_p8, %p3030_p0 }
 0xaf2   : > { %3038 = shalt.err (!%p3035_p9)
}
 0xaf3   : > { %2572 = dma.vmem_to_hbm [thread:$0]  (%p3464_p12), %s2064_s7, 128, %s2061_s26, %s2043_s3  }
 0xaf4 PF: > { %p2624_p11 = scmp.ge.s32.totalorder %s3153_s4, 2  ;;  %s2092_s30 = sand.u32 1, %s3113_s1  }
 0xaf5   : > { %s2093_s24 = scalar_lea.sflag [#allocation7], %s2092_s30 }
 0xaf6   : > { %p2603_p10 = pnand %p2624_p11, %p3477_p13 }
 0xaf8   : > { %p2604_p3 = pneg %p2603_p10 }
 0xafa   : > { %3104 = dma.done.wait (%p2604_p3), %s2093_s24, 128  }
 0xafb   : > { %3106 = vsyncadd (%p2604_p3), %s2093_s24, 4294967168  ;;  %s2102_s14 = scalar_lea.sflag [#allocation21], %s2092_s30 }
 0xafc   : > { %3108 = dma.done.wait (%p2604_p3), %s2102_s14, 512  }
 0xafd   : > { %3110 = vsyncadd (%p2604_p3), %s2102_s14, 4294966784  ;;  %s44_s4 = sadd.s32 1, %s3153_s4   ;;  %s3900_s29 = sld [smem:[#allocation33_spill]] }
 0xafe   : > { %p41_p1 = scmp.ge.s32.totalorder %s44_s4, 6   ;;  %s3901_s3 = sld [smem:[#allocation29_spill]] }
 0xaff   : > { %s3902_s26 = sld [smem:[#allocation30_spill]]  ;;  %s3905_s1 = smov %s3117_s22 }
 0xb00   : > { %s3903_s27 = sld [smem:[#allocation31_spill]]  ;;  %s3906_s22 = smov %s3121_s23 }
 0xb01   : > { %s3904_s28 = sld [smem:[#allocation32_spill]]  ;;  %s3907_s23 = smov %s3472_s15 }
 0xb02   : > { %s3908_s24 = smov %s3129_s2  ;;  %s3909_s2 = smov %s3133_s25 }
 0xb03   : > { %s3910_s25 = smov %s3900_s29  ;;  %43 = sbr.rel (!%p41_p1) target bundleno = 37 (0x25), region = 205 }
 0xb08   :  { %2107 = vsyncpa [#allocation6], 1 }
 0xb09   :  { %2109 = vsyncpa [#allocation6 + $0x1], 1 }
 0xb0a   :  { %2110 = vsyncpa [#allocation9], 1 }
 0xb0b   :  { %2111 = vsyncpa [#allocation12], 1 }
 0xb0c   :  { %2112 = vsyncpa [#allocation15], 1 }
 0xb0d   :  { %2113 = vsyncpa [#allocation18], 1 }
 0xb0e   :  { %2114 = vsyncpa [#allocation7], 1 }
 0xb0f   :  { %2116 = vsyncpa [#allocation7 + $0x1], 1 }
 0xb10   :  { %2117 = vsyncpa [#allocation21], 1 }
 0xb11   :  { %2119 = vsyncpa [#allocation21 + $0x1], 1 }

</bundles_post_ra>
